<compile_context>
chip_gen: v6e
topology: v6e:2x2x1
jax: 0.10.0
libtpu: 0.0.40
codegen_flags: <defaults>
</compile_context>

<pallas_src>
import functools
import math
import typing as tp
from dataclasses import dataclass

import jax
import jax.numpy as jnp
from jax import lax
from jax.experimental import pallas as pl
from jax.experimental.pallas import tpu as pltpu

_NEG = -1e30  # finite "minus infinity" for the additive attention mask


# -----------------------------------------------------------------------------
# Output container (mirrors GPTAOutput)
# -----------------------------------------------------------------------------
@dataclass
class GPTAOutput:
    emb: jnp.ndarray
    prompt: tp.Optional[jnp.ndarray] = None
    prompt_lens: tp.Optional[jnp.ndarray] = None
    response: tp.Optional[jnp.ndarray] = None
    response_lens: tp.Optional[jnp.ndarray] = None
    target: tp.Optional[jnp.ndarray] = None
    target_lens: tp.Optional[jnp.ndarray] = None


# -----------------------------------------------------------------------------
# Pallas kernel: one (batch_group, layer) grid step of the pre-norm GPT decoder.
# The residual stream for the whole batch block is carried across the layer axis
# in VMEM scratch; the final projection is applied at the last layer step.
# -----------------------------------------------------------------------------
def _gpt_stack_kernel(n_heads, Lp, Bb,                    # static (functools.partial)
                      lens_ref,                           # SMEM [B, 2] (prompt_len, resp_len)
                      x_ref,                              # [Bb, L, H] f32
                      ln1g_ref, ln1b_ref, wqkv_ref, bqkv_ref, wo_ref, bo_ref,
                      ln2g_ref, ln2b_ref, w1_ref, b1_ref, w2_ref, b2_ref,
                      wp_ref, bp_ref,                     # final proj (layer-invariant)
                      out_ref,                            # [Bb, L, H] f32
                      x_scr):                             # VMEM [Bb, L, H] f32
    g = pl.program_id(0)
    l = pl.program_id(1)
    n_layers = pl.num_programs(1)

    _, L, H = x_scr.shape
    hd = H // n_heads
    scale = 1.0 / math.sqrt(hd)

    # ---- per-batch-group init: load the residual stream (already f32) ----
    @pl.when(l == 0)
    def _init():
        x_scr[...] = x_ref[...]

    ln1g, ln1b = ln1g_ref[0], ln1b_ref[0]
    wqkv, bqkv = wqkv_ref[0], bqkv_ref[0]
    wo, bo = wo_ref[0], bo_ref[0]
    ln2g, ln2b = ln2g_ref[0], ln2b_ref[0]
    w1, b1 = w1_ref[0], b1_ref[0]
    w2, b2 = w2_ref[0], b2_ref[0]

    def layer_norm(v, gam, bet):
        mu = jnp.mean(v, axis=-1, keepdims=True)
        var = jnp.mean(jnp.square(v - mu), axis=-1, keepdims=True)
        return (v - mu) * lax.rsqrt(var + 1e-5) * gam + bet

    row = lax.broadcasted_iota(jnp.int32, (L, L), 0)
    col = lax.broadcasted_iota(jnp.int32, (L, L), 1)

    for bi in range(Bb):                                  # static batch-block loop
        b_global = g * Bb + bi
        plen = lens_ref[b_global, 0]
        rlen = lens_ref[b_global, 1]
        # Additive mask recomputed in-kernel (no [L,L] VMEM scratch, hides under MXU).
        blocked = (((col < Lp) & (col >= plen)) |          # padded prompt keys
                   ((col >= Lp) & ((col - Lp) >= rlen)) |  # padded response keys
                   ((col >= Lp) & (col > row)))            # cross + causal structure
        bias = jnp.where(blocked, _NEG, 0.0).astype(jnp.float32)

        x = x_scr[bi]                                      # [L, H] f32

        # ---- multi-head self-attention (norm_first), fused QKV ----
        h = layer_norm(x, ln1g, ln1b)
        qkv = jnp.dot(h.astype(jnp.bfloat16), wqkv,
                      preferred_element_type=jnp.float32) + bqkv       # [L, 3H] f32
        q_all = (qkv[:, :H] * scale).astype(jnp.bfloat16)  # scale folded into q
        k_all = qkv[:, H:2 * H].astype(jnp.bfloat16)
        v_all = qkv[:, 2 * H:].astype(jnp.bfloat16)

        attn = jnp.zeros((L, H), jnp.float32)
        for hi in range(n_heads):
            sl = slice(hi * hd, (hi + 1) * hd)
            s = lax.dot_general(q_all[:, sl], k_all[:, sl],
                                (((1,), (1,)), ((), ())),
                                preferred_element_type=jnp.float32) + bias
            s = s - jnp.max(s, axis=-1, keepdims=True)
            p = jnp.exp(s)
            p = p * pl.reciprocal(jnp.sum(p, axis=-1, keepdims=True), approx=True)
            ctx_h = jnp.dot(p.astype(jnp.bfloat16), v_all[:, sl],
                            preferred_element_type=jnp.float32)        # [L, hd]
            # Per-head slice of the output projection -> lane-dense [L, H] accumulate
            # (replaces the [L, hd] concat over heads).
            attn = attn + jnp.dot(ctx_h.astype(jnp.bfloat16), wo[sl, :],
                                  preferred_element_type=jnp.float32)
        x = x + attn + bo

        # ---- feed-forward (norm_first) ----
        h = layer_norm(x, ln2g, ln2b)
        h = jnp.dot(h.astype(jnp.bfloat16), w1,
                    preferred_element_type=jnp.float32) + b1
        h = jnp.maximum(h, 0.0)
        h = jnp.dot(h.astype(jnp.bfloat16), w2,
                    preferred_element_type=jnp.float32) + b2
        x = x + h

        x_scr[bi] = x

        # ---- final projection (self.proj) only on the last layer step ----
        @pl.when(l == n_layers - 1)
        def _finalize():
            out = jnp.dot(x.astype(jnp.bfloat16), wp_ref[...],
                          preferred_element_type=jnp.float32) + bp_ref[...]
            out_ref[bi] = out.astype(out_ref.dtype)


_LAYER_KEYS = ("ln1_g", "ln1_b", "wqkv", "bqkv", "wo", "bo",
               "ln2_g", "ln2_b", "w1", "b1", "w2", "b2")
_FINAL_KEYS = ("wp", "bp")
_BF16_KEYS = ("wqkv", "wo", "w1", "w2", "wp")


def pack_decoder_weights(params):
    """Matmul weights -> bf16 (f32 accumulation in-kernel); biases/LN stay f32.
    Call ONCE outside the forward and reuse the packed dict."""
    out = {}
    for k in _LAYER_KEYS + _FINAL_KEYS:
        arr = params[k]
        out[k] = arr.astype(jnp.bfloat16) if k in _BF16_KEYS else arr.astype(jnp.float32)
    return out


def _vmem_limit_bytes():
    """Derive the scoped-VMEM budget from the device (leave ~15% headroom)
    instead of hard-coding a number that over-commits v7x / under-uses v5e/v6e."""
    try:
        return int(pltpu.get_tpu_info().vmem_capacity_bytes * 0.85)
    except Exception:
        return None


def gpt_decoder(x, lens, Lp, packed, n_heads, *, n_batch_groups=None):
    """x: [B, L, H] f32; lens: [B, 2] int32 (prompt_len, resp_len); Lp: static int;
    packed: output of pack_decoder_weights()."""
    B, L, H = x.shape
    n_layers = packed["wqkv"].shape[0]

    # Batch-block so one layer-weight DMA serves Bb batch elements.  Keep (at
    # most) two groups on the "parallel" axis so v7x's two TensorCores both work.
    if n_batch_groups is None:
        n_batch_groups = min(B, 2)
    Bb = -(-B // n_batch_groups)
    Bp = Bb * n_batch_groups
    if Bp != B:
        x = jnp.pad(x, ((0, Bp - B), (0, 0), (0, 0)))
        lens = jnp.pad(lens, ((0, Bp - B), (0, 0)))

    def layer_spec(arr):                       # stream one layer's slab per step
        zeros = (0,) * (arr.ndim - 1)
        return pl.BlockSpec((1,) + arr.shape[1:], lambda g, l, *_: (l,) + zeros)

    def full_spec(arr):                        # layer-invariant (final proj)
        zeros = (0,) * arr.ndim
        return pl.BlockSpec(arr.shape, lambda g, l, *_: zeros)

    in_specs = [pl.BlockSpec((Bb, L, H), lambda g, l, *_: (g, 0, 0))]
    in_specs += [layer_spec(packed[k]) for k in _LAYER_KEYS]
    in_specs += [full_spec(packed[k]) for k in _FINAL_KEYS]

    kernel = functools.partial(_gpt_stack_kernel, n_heads, Lp, Bb)

    compiler_kwargs = dict(dimension_semantics=("parallel", "arbitrary"))
    vmem_limit = _vmem_limit_bytes()
    if vmem_limit is not None:
        compiler_kwargs["vmem_limit_bytes"] = vmem_limit

    out = pl.pallas_call(
        kernel,
        out_shape=jax.ShapeDtypeStruct((Bp, L, H), jnp.float32),
        grid_spec=pltpu.PrefetchScalarGridSpec(
            num_scalar_prefetch=1,
            grid=(n_batch_groups, n_layers),
            in_specs=in_specs,
            out_specs=pl.BlockSpec((Bb, L, H), lambda g, l, *_: (g, 0, 0)),
            scratch_shapes=[pltpu.VMEM((Bb, L, H), jnp.float32)],   # residual stream
        ),
        compiler_params=pltpu.CompilerParams(**compiler_kwargs),
    )(lens, x, *[packed[k] for k in _LAYER_KEYS], *[packed[k] for k in _FINAL_KEYS])
    return out[:B]


# -----------------------------------------------------------------------------
# Plain-JAX reference of the decoder hot path (for in-script validation).
# -----------------------------------------------------------------------------
def _layer_norm_ref(v, g, b):
    mu = jnp.mean(v, axis=-1, keepdims=True)
    var = jnp.mean(jnp.square(v - mu), axis=-1, keepdims=True)
    return (v - mu) * lax.rsqrt(var + 1e-5) * g + b


def gpt_decoder_ref(x, lens, Lp, packed, n_heads):
    w = packed
    B, L, H = x.shape
    n_layers = w["wqkv"].shape[0]
    hd = H // n_heads
    scale = 1.0 / math.sqrt(hd)
    pos = jnp.arange(L)
    row, col = pos[:, None], pos[None, :]
    outs = []
    for b in range(B):
        plen, rlen = lens[b, 0], lens[b, 1]
        blocked = (((col < Lp) & (col >= plen)) |
                   ((col >= Lp) & ((col - Lp) >= rlen)) |
                   ((col >= Lp) & (col > row)))
        bias = jnp.where(blocked, _NEG, 0.0).astype(jnp.float32)
        xb = x[b].astype(jnp.float32)
        for l in range(n_layers):
            h = _layer_norm_ref(xb, w["ln1_g"][l], w["ln1_b"][l])
            qkv = jnp.dot(h.astype(jnp.bfloat16), w["wqkv"][l],
                          preferred_element_type=jnp.float32) + w["bqkv"][l]
            attn = jnp.zeros((L, H), jnp.float32)
            for hi in range(n_heads):
                q = (qkv[:, hi * hd:(hi + 1) * hd] * scale).astype(jnp.bfloat16)
                k = qkv[:, H + hi * hd:H + (hi + 1) * hd].astype(jnp.bfloat16)
                v = qkv[:, 2 * H + hi * hd:2 * H + (hi + 1) * hd].astype(jnp.bfloat16)
                s = jnp.dot(q, k.T, preferred_element_type=jnp.float32) + bias
                s = s - jnp.max(s, axis=-1, keepdims=True)
                p = jnp.exp(s)
                p = p / jnp.sum(p, axis=-1, keepdims=True)
                ctx = jnp.dot(p.astype(jnp.bfloat16), v,
                              preferred_element_type=jnp.float32)
                attn = attn + jnp.dot(ctx.astype(jnp.bfloat16),
                                      w["wo"][l][hi * hd:(hi + 1) * hd, :],
                                      preferred_element_type=jnp.float32)
            xb = xb + attn + w["bo"][l]
            h = _layer_norm_ref(xb, w["ln2_g"][l], w["ln2_b"][l])
            h = jnp.dot(h.astype(jnp.bfloat16), w["w1"][l],
                        preferred_element_type=jnp.float32) + w["b1"][l]
            h = jnp.maximum(h, 0.0)
            h = jnp.dot(h.astype(jnp.bfloat16), w["w2"][l],
                        preferred_element_type=jnp.float32) + w["b2"][l]
            xb = xb + h
        out = jnp.dot(xb.astype(jnp.bfloat16), w["wp"],
                      preferred_element_type=jnp.float32) + w["bp"]
        outs.append(out)
    return jnp.stack(outs, axis=0)


# -----------------------------------------------------------------------------
# Plain-JAX glue reproducing the GPTA forward pass (eval mode, discrete resp.)
# -----------------------------------------------------------------------------
def sine_pe(length, dim):
    pos = jnp.arange(length, dtype=jnp.float32)[:, None]
    div = jnp.exp(jnp.arange(0, dim, 2, dtype=jnp.float32) * (-math.log(10000.0) / dim))
    pe = jnp.zeros((length, dim), jnp.float32)
    pe = pe.at[:, 0::2].set(jnp.sin(pos * div))
    pe = pe.at[:, 1::2].set(jnp.cos(pos * div))
    return pe


def multi_embedding(table, tokens):
    """table: [n_levels, n_tokens, H]; tokens: [B, T, n_levels] int -> [B, T, H]."""
    out = jnp.zeros(tokens.shape[:2] + (table.shape[-1],), table.dtype)
    for lvl in range(table.shape[0]):
        out = out + table[lvl][tokens[..., lvl]]
    return out


def cat_on_edge(text_emb, text_lens, audio_emb, audio_lens):
    """Vectorized ragged [text | audio] concat per batch, padded to the static
    max length. (PyTorch pads to the dynamic batch max; the extra tail positions
    here are padding and are masked out in attention.)"""
    B, Lt, H = text_emb.shape
    La = audio_emb.shape[1]
    Lp = Lt + La
    pos = jnp.arange(Lp)[None, :]                          # [1, Lp]
    tl = text_lens[:, None]
    al = audio_lens[:, None]
    from_text = pos < tl                                   # [B, Lp]
    from_audio = (pos >= tl) & (pos < tl + al)
    t_idx = jnp.broadcast_to(jnp.clip(pos, 0, Lt - 1), (B, Lp))
    a_idx = jnp.clip(pos - tl, 0, La - 1)
    g_text = jnp.take_along_axis(text_emb,
                                 jnp.broadcast_to(t_idx[..., None], (B, Lp, H)), axis=1)
    g_audio = jnp.take_along_axis(audio_emb,
                                  jnp.broadcast_to(a_idx[..., None], (B, Lp, H)), axis=1)
    prompt = jnp.where(from_text[..., None], g_text,
                       jnp.where(from_audio[..., None], g_audio, 0.0))
    return prompt, text_lens + audio_lens


def init_params(key, H, n_heads, n_layers, num_tokens_text, num_tokens_audio,
                dim_prompt_audio, d_ff):
    keys = iter(jax.random.split(key, 32))

    def nrm(shape, scl=0.02):
        return jax.random.normal(next(keys), shape, jnp.float32) * scl

    p = {}
    # embeddings / projections
    p["emb_text"] = nrm((1, num_tokens_text, H), 1.0)             # MultiEmbedding (1 level)
    p["emb_response"] = nrm((1, num_tokens_audio + 1, H), 1.0)    # MultiEmbedding (+EOS token)
    p["emb_audio_w"] = nrm((dim_prompt_audio, H))                 # ConditioningEncoder approx.
    p["emb_audio_b"] = jnp.zeros((H,), jnp.float32)
    # service tokens
    p["bot"] = nrm((1, 1, H), 1.0)
    p["boa"] = nrm((1, 1, H), 1.0)
    p["bor"] = nrm((1, 1, H), 1.0)
    # positional-encoding learnable alpha (init 1.0)
    p["pe_alpha_prompt"] = jnp.ones((), jnp.float32)
    # decoder weights (stacked over layers; fused QKV and fused output proj)
    p["ln1_g"] = jnp.ones((n_layers, 1, H), jnp.float32)
    p["ln1_b"] = jnp.zeros((n_layers, 1, H), jnp.float32)
    p["wqkv"] = nrm((n_layers, H, 3 * H))
    p["bqkv"] = jnp.zeros((n_layers, 1, 3 * H), jnp.float32)
    p["wo"] = nrm((n_layers, H, H))
    p["bo"] = jnp.zeros((n_layers, 1, H), jnp.float32)
    p["ln2_g"] = jnp.ones((n_layers, 1, H), jnp.float32)
    p["ln2_b"] = jnp.zeros((n_layers, 1, H), jnp.float32)
    p["w1"] = nrm((n_layers, H, d_ff))
    p["b1"] = jnp.zeros((n_layers, 1, d_ff), jnp.float32)
    p["w2"] = nrm((n_layers, d_ff, H))
    p["b2"] = jnp.zeros((n_layers, 1, H), jnp.float32)
    # final proj (nn.Linear(H, H))
    p["wp"] = nrm((H, H))
    p["bp"] = jnp.zeros((1, H), jnp.float32)
    return p


def _prepare_decoder_inputs(params, cfg, prompt_text, prompt_text_lens,
                            prompt_audio, prompt_audio_lens, response, response_lens):
    B = prompt_text.shape[0]
    H = cfg["dim_hidden"]

    # ---- prepare_prompt_text ----
    text_emb = multi_embedding(params["emb_text"], prompt_text)           # [B, Lt, H]
    # TODO(synk): PrenetText definition not provided in the source; treated as identity.
    bot = jnp.broadcast_to(params["bot"], (B, 1, H))
    text_emb = jnp.concatenate([bot, text_emb], axis=1)
    text_lens = prompt_text_lens + 1

    # ---- prepare_prompt_audio ----
    # TODO(synk): ConditioningEncoder internals not provided; approximated as a linear projection.
    audio_emb = prompt_audio @ params["emb_audio_w"] + params["emb_audio_b"]
    # TODO(synk): PrenetAudio definition not provided in the source; treated as identity.
    boa = jnp.broadcast_to(params["boa"], (B, 1, H))
    audio_emb = jnp.concatenate([boa, audio_emb], axis=1)
    audio_lens = prompt_audio_lens + 1

    # ---- cat_on_edge (vectorized ragged concat) + SinePositionalEmbedding ----
    prompt, prompt_lens = cat_on_edge(text_emb, text_lens, audio_emb, audio_lens)
    Lp = prompt.shape[1]
    prompt = prompt + params["pe_alpha_prompt"] * sine_pe(Lp, H)[None]

    # ---- prepare_response (eval mode: training-time EOS masking skipped) ----
    resp_emb = multi_embedding(params["emb_response"], response)
    bor = jnp.broadcast_to(params["bor"], (B, 1, H))
    resp_emb = jnp.concatenate([bor, resp_emb], axis=1)                   # [B, Lr, H]
    resp_lens = response_lens + 1
    target = response

    x = jnp.concatenate([prompt, resp_emb], axis=1).astype(jnp.float32)   # [B, Ltot, H]
    lens = jnp.stack([prompt_lens, resp_lens], axis=1).astype(jnp.int32)  # [B, 2]
    return x, lens, Lp, prompt, prompt_lens, resp_emb, resp_lens, target


def gpta_forward(params, cfg, prompt_text, prompt_text_lens,
                 prompt_audio, prompt_audio_lens, response, response_lens,
                 packed_decoder=None):
    if packed_decoder is None:           # prefer pre-packing once outside the forward
        packed_decoder = pack_decoder_weights(params)

    x, lens, Lp, prompt, prompt_lens, resp_emb, resp_lens, target = _prepare_decoder_inputs(
        params, cfg, prompt_text, prompt_text_lens,
        prompt_audio, prompt_audio_lens, response, response_lens)

    emb = gpt_decoder(x, lens, Lp, packed_decoder, cfg["n_heads"])

    return GPTAOutput(emb=emb, prompt=prompt, prompt_lens=prompt_lens,
                      response=resp_emb, response_lens=resp_lens,
                      target=target, target_lens=resp_lens - 1)


# -----------------------------------------------------------------------------
# Example run
# -----------------------------------------------------------------------------
if __name__ == "__main__":
    # H / d_ff kept as multiples of 128 so the kernel runs lane-dense vregs.
    cfg = dict(dim_hidden=128, n_heads=2, n_layers=2,
               num_tokens_text=50, num_tokens_audio=60,
               dim_prompt_audio=12, d_ff=256)

    key = jax.random.PRNGKey(0)
    kp, kt, ka, kr = jax.random.split(key, 4)
    params = init_params(kp, cfg["dim_hidden"], cfg["n_heads"], cfg["n_layers"],
                         cfg["num_tokens_text"], cfg["num_tokens_audio"],
                         cfg["dim_prompt_audio"], cfg["d_ff"])

    # Pre-pack matmul weights to bf16 ONCE (outside the forward) and reuse.
    packed_decoder = pack_decoder_weights(params)

    B, Lt, La, Lr = 2, 6, 5, 7
    prompt_text = jax.random.randint(kt, (B, Lt, 1), 0, cfg["num_tokens_text"], jnp.int32)
    prompt_text_lens = jnp.array([6, 4], jnp.int32)
    prompt_audio = jax.random.normal(ka, (B, La, cfg["dim_prompt_audio"]), jnp.float32)
    prompt_audio_lens = jnp.array([5, 3], jnp.int32)
    response = jax.random.randint(kr, (B, Lr, 1), 0, cfg["num_tokens_audio"], jnp.int32)
    response_lens = jnp.array([7, 5], jnp.int32)

    out = gpta_forward(params, cfg, prompt_text, prompt_text_lens,
                       prompt_audio, prompt_audio_lens, response, response_lens,
                       packed_decoder=packed_decoder)
    jax.block_until_ready(out.emb)

    # prompt padded to (6+1)+(5+1)=13; response 7+1=8 -> total seq 21
    assert out.emb.shape == (B, 21, cfg["dim_hidden"]), out.emb.shape
    assert bool(jnp.all(jnp.isfinite(out.emb)))

    # Validate the Pallas decoder against a plain-JAX reference (same bf16 weights).
    x_dec, lens, Lp, *_ = _prepare_decoder_inputs(
        params, cfg, prompt_text, prompt_text_lens,
        prompt_audio, prompt_audio_lens, response, response_lens)
    ref = gpt_decoder_ref(x_dec, lens, Lp, packed_decoder, cfg["n_heads"])
    max_err = float(jnp.max(jnp.abs(out.emb - ref)))
    assert max_err < 5e-2, f"kernel/reference mismatch: max abs err = {max_err}"

    print("KERNEL_OK")
</pallas_src>

<mosaic_0001>
module attributes {stable_mosaic.version = 11 : i64} {
  func.func @_gpt_stack_kernel(%arg0: i32, %arg1: i32, %arg2: memref<2x2xi32, #tpu.memory_space<smem>>, %arg3: memref<1x21x128xf32, #tpu.memory_space<vmem>>, %arg4: memref<1x1x128xf32, #tpu.memory_space<vmem>>, %arg5: memref<1x1x128xf32, #tpu.memory_space<vmem>>, %arg6: memref<1x128x384xbf16, #tpu.memory_space<vmem>>, %arg7: memref<1x1x384xf32, #tpu.memory_space<vmem>>, %arg8: memref<1x128x128xbf16, #tpu.memory_space<vmem>>, %arg9: memref<1x1x128xf32, #tpu.memory_space<vmem>>, %arg10: memref<1x1x128xf32, #tpu.memory_space<vmem>>, %arg11: memref<1x1x128xf32, #tpu.memory_space<vmem>>, %arg12: memref<1x128x256xbf16, #tpu.memory_space<vmem>>, %arg13: memref<1x1x256xf32, #tpu.memory_space<vmem>>, %arg14: memref<1x256x128xbf16, #tpu.memory_space<vmem>>, %arg15: memref<1x1x128xf32, #tpu.memory_space<vmem>>, %arg16: memref<128x128xbf16, #tpu.memory_space<vmem>>, %arg17: memref<1x128xf32, #tpu.memory_space<vmem>>, %arg18: memref<1x21x128xf32, #tpu.memory_space<vmem>>, %arg19: memref<1x21x128xf32, #tpu.memory_space<vmem>>) attributes {dimension_semantics = [#tpu.dimension_semantics<parallel>, #tpu.dimension_semantics<arbitrary>], iteration_bounds = array<i64: 2, 2>, scalar_prefetch = 1 : i64, scratch_operands = 1 : i64, tpu.core_type = #tpu.core_type<tc>, window_params = [{transform_indices = @transform_0, window_bounds = array<i64: 1, 21, 128>}, {transform_indices = @transform_1, window_bounds = array<i64: 1, 1, 128>}, {transform_indices = @transform_2, window_bounds = array<i64: 1, 1, 128>}, {transform_indices = @transform_3, window_bounds = array<i64: 1, 128, 384>}, {transform_indices = @transform_4, window_bounds = array<i64: 1, 1, 384>}, {transform_indices = @transform_5, window_bounds = array<i64: 1, 128, 128>}, {transform_indices = @transform_6, window_bounds = array<i64: 1, 1, 128>}, {transform_indices = @transform_7, window_bounds = array<i64: 1, 1, 128>}, {transform_indices = @transform_8, window_bounds = array<i64: 1, 1, 128>}, {transform_indices = @transform_9, window_bounds = array<i64: 1, 128, 256>}, {transform_indices = @transform_10, window_bounds = array<i64: 1, 1, 256>}, {transform_indices = @transform_11, window_bounds = array<i64: 1, 256, 128>}, {transform_indices = @transform_12, window_bounds = array<i64: 1, 1, 128>}, {pipeline_mode = #tpu.pipeline_mode<synchronous>, transform_indices = @transform_13, window_bounds = array<i64: 128, 128>}, {pipeline_mode = #tpu.pipeline_mode<synchronous>, transform_indices = @transform_14, window_bounds = array<i64: 1, 128>}, {transform_indices = @transform_15, window_bounds = array<i64: 1, 21, 128>}]} {
    %c0_i32 = arith.constant 0 : i32
    %0 = arith.cmpi eq, %arg1, %c0_i32 : i32
    %1 = arith.extui %0 : i1 to i32
    %c0_i32_0 = arith.constant 0 : i32
    %2 = arith.cmpi ne, %1, %c0_i32_0 : i32
    scf.if %2 {
      %c0_76 = arith.constant 0 : index
      %c0_77 = arith.constant 0 : index
      %c0_78 = arith.constant 0 : index
      %177 = vector.load %arg3[%c0_76, %c0_77, %c0_78] : memref<1x21x128xf32, #tpu.memory_space<vmem>>, vector<1x21x128xf32>
      %c0_79 = arith.constant 0 : index
      %c0_80 = arith.constant 0 : index
      %c0_81 = arith.constant 0 : index
      %178 = vector.load %arg19[%c0_79, %c0_80, %c0_81] : memref<1x21x128xf32, #tpu.memory_space<vmem>>, vector<1x21x128xf32>
      tpu.vector_store %arg19[%c0_79, %c0_80, %c0_81], %177 {strides = array<i32>} : memref<1x21x128xf32, #tpu.memory_space<vmem>>, vector<1x21x128xf32>,
    } else {
    }
    %c0 = arith.constant 0 : index
    %c0_1 = arith.constant 0 : index
    %c0_2 = arith.constant 0 : index
    %3 = vector.load %arg4[%c0, %c0_1, %c0_2] : memref<1x1x128xf32, #tpu.memory_space<vmem>>, vector<1x1x128xf32>
    %4 = vector.shape_cast %3 : vector<1x1x128xf32> to vector<1x128xf32>
    %c0_3 = arith.constant 0 : index
    %c0_4 = arith.constant 0 : index
    %c0_5 = arith.constant 0 : index
    %5 = vector.load %arg5[%c0_3, %c0_4, %c0_5] : memref<1x1x128xf32, #tpu.memory_space<vmem>>, vector<1x1x128xf32>
    %6 = vector.shape_cast %5 : vector<1x1x128xf32> to vector<1x128xf32>
    %c0_6 = arith.constant 0 : index
    %c0_7 = arith.constant 0 : index
    %c0_8 = arith.constant 0 : index
    %7 = vector.load %arg6[%c0_6, %c0_7, %c0_8] : memref<1x128x384xbf16, #tpu.memory_space<vmem>>, vector<1x128x384xbf16>
    %8 = vector.shape_cast %7 : vector<1x128x384xbf16> to vector<128x384xbf16>
    %c0_9 = arith.constant 0 : index
    %c0_10 = arith.constant 0 : index
    %c0_11 = arith.constant 0 : index
    %9 = vector.load %arg7[%c0_9, %c0_10, %c0_11] : memref<1x1x384xf32, #tpu.memory_space<vmem>>, vector<1x1x384xf32>
    %10 = vector.shape_cast %9 : vector<1x1x384xf32> to vector<1x384xf32>
    %c0_12 = arith.constant 0 : index
    %c0_13 = arith.constant 0 : index
    %c0_14 = arith.constant 0 : index
    %11 = vector.load %arg8[%c0_12, %c0_13, %c0_14] : memref<1x128x128xbf16, #tpu.memory_space<vmem>>, vector<1x128x128xbf16>
    %12 = vector.shape_cast %11 : vector<1x128x128xbf16> to vector<128x128xbf16>
    %c0_15 = arith.constant 0 : index
    %c0_16 = arith.constant 0 : index
    %c0_17 = arith.constant 0 : index
    %13 = vector.load %arg9[%c0_15, %c0_16, %c0_17] : memref<1x1x128xf32, #tpu.memory_space<vmem>>, vector<1x1x128xf32>
    %14 = vector.shape_cast %13 : vector<1x1x128xf32> to vector<1x128xf32>
    %c0_18 = arith.constant 0 : index
    %c0_19 = arith.constant 0 : index
    %c0_20 = arith.constant 0 : index
    %15 = vector.load %arg10[%c0_18, %c0_19, %c0_20] : memref<1x1x128xf32, #tpu.memory_space<vmem>>, vector<1x1x128xf32>
    %16 = vector.shape_cast %15 : vector<1x1x128xf32> to vector<1x128xf32>
    %c0_21 = arith.constant 0 : index
    %c0_22 = arith.constant 0 : index
    %c0_23 = arith.constant 0 : index
    %17 = vector.load %arg11[%c0_21, %c0_22, %c0_23] : memref<1x1x128xf32, #tpu.memory_space<vmem>>, vector<1x1x128xf32>
    %18 = vector.shape_cast %17 : vector<1x1x128xf32> to vector<1x128xf32>
    %c0_24 = arith.constant 0 : index
    %c0_25 = arith.constant 0 : index
    %c0_26 = arith.constant 0 : index
    %19 = vector.load %arg12[%c0_24, %c0_25, %c0_26] : memref<1x128x256xbf16, #tpu.memory_space<vmem>>, vector<1x128x256xbf16>
    %20 = vector.shape_cast %19 : vector<1x128x256xbf16> to vector<128x256xbf16>
    %c0_27 = arith.constant 0 : index
    %c0_28 = arith.constant 0 : index
    %c0_29 = arith.constant 0 : index
    %21 = vector.load %arg13[%c0_27, %c0_28, %c0_29] : memref<1x1x256xf32, #tpu.memory_space<vmem>>, vector<1x1x256xf32>
    %22 = vector.shape_cast %21 : vector<1x1x256xf32> to vector<1x256xf32>
    %c0_30 = arith.constant 0 : index
    %c0_31 = arith.constant 0 : index
    %c0_32 = arith.constant 0 : index
    %23 = vector.load %arg14[%c0_30, %c0_31, %c0_32] : memref<1x256x128xbf16, #tpu.memory_space<vmem>>, vector<1x256x128xbf16>
    %24 = vector.shape_cast %23 : vector<1x256x128xbf16> to vector<256x128xbf16>
    %c0_33 = arith.constant 0 : index
    %c0_34 = arith.constant 0 : index
    %c0_35 = arith.constant 0 : index
    %25 = vector.load %arg15[%c0_33, %c0_34, %c0_35] : memref<1x1x128xf32, #tpu.memory_space<vmem>>, vector<1x1x128xf32>
    %26 = vector.shape_cast %25 : vector<1x1x128xf32> to vector<1x128xf32>
    %27 = tpu.iota {dimensions = array<i32: 0>} : vector<21x21xi32>
    %28 = tpu.iota {dimensions = array<i32: 1>} : vector<21x21xi32>
    %c1_i32 = arith.constant 1 : i32
    %29 = arith.muli %arg0, %c1_i32 : i32
    %c0_i32_36 = arith.constant 0 : i32
    %30 = arith.addi %29, %c0_i32_36 : i32
    %31 = arith.index_cast %30 : i32 to index
    %c0_37 = arith.constant 0 : index
    %32 = memref.load %arg2[%31, %c0_37] : memref<2x2xi32, #tpu.memory_space<smem>>
    %33 = arith.index_cast %30 : i32 to index
    %c1 = arith.constant 1 : index
    %34 = memref.load %arg2[%33, %c1] : memref<2x2xi32, #tpu.memory_space<smem>>
    %c13_i32 = arith.constant 13 : i32
    %35 = vector.broadcast %c13_i32 : i32 to vector<21x21xi32>
    %36 = arith.cmpi slt, %28, %35 : vector<21x21xi32>
    %37 = vector.broadcast %32 : i32 to vector<21x21xi32>
    %38 = arith.cmpi sge, %28, %37 : vector<21x21xi32>
    %39 = arith.andi %36, %38 : vector<21x21xi1>
    %c13_i32_38 = arith.constant 13 : i32
    %40 = vector.broadcast %c13_i32_38 : i32 to vector<21x21xi32>
    %41 = arith.cmpi sge, %28, %40 : vector<21x21xi32>
    %c13_i32_39 = arith.constant 13 : i32
    %42 = vector.broadcast %c13_i32_39 : i32 to vector<21x21xi32>
    %43 = arith.subi %28, %42 : vector<21x21xi32>
    %44 = vector.broadcast %34 : i32 to vector<21x21xi32>
    %45 = arith.cmpi sge, %43, %44 : vector<21x21xi32>
    %46 = arith.andi %41, %45 : vector<21x21xi1>
    %47 = arith.ori %39, %46 : vector<21x21xi1>
    %c13_i32_40 = arith.constant 13 : i32
    %48 = vector.broadcast %c13_i32_40 : i32 to vector<21x21xi32>
    %49 = arith.cmpi sge, %28, %48 : vector<21x21xi32>
    %50 = arith.cmpi sgt, %28, %27 : vector<21x21xi32>
    %51 = arith.andi %49, %50 : vector<21x21xi1>
    %52 = arith.ori %47, %51 : vector<21x21xi1>
    %cst = arith.constant -1.000000e+30 : f32
    %cst_41 = arith.constant 0.000000e+00 : f32
    %53 = vector.broadcast %cst : f32 to vector<21x21xf32>
    %54 = vector.broadcast %cst_41 : f32 to vector<21x21xf32>
    %55 = arith.select %52, %53, %54 : vector<21x21xi1>, vector<21x21xf32>
    %c0_42 = arith.constant 0 : index
    %c0_43 = arith.constant 0 : index
    %c0_44 = arith.constant 0 : index
    %56 = vector.load %arg19[%c0_42, %c0_43, %c0_44] : memref<1x21x128xf32, #tpu.memory_space<vmem>>, vector<1x21x128xf32>
    %57 = vector.shape_cast %56 : vector<1x21x128xf32> to vector<21x128xf32>
    %cst_45 = arith.constant dense<0.000000e+00> : vector<21xf32>
    %58 = vector.multi_reduction <add>, %57, %cst_45 [1] : vector<21x128xf32> to vector<21xf32>
    %59 = vector.shape_cast %58 : vector<21xf32> to vector<21x1xf32>
    %cst_46 = arith.constant 1.280000e+02 : f32
    %60 = vector.broadcast %cst_46 : f32 to vector<21x1xf32>
    %61 = arith.divf %59, %60 : vector<21x1xf32>
    %62 = vector.broadcast %61 : vector<21x1xf32> to vector<21x128xf32>
    %63 = arith.subf %57, %62 : vector<21x128xf32>
    %64 = arith.mulf %63, %63 : vector<21x128xf32>
    %cst_47 = arith.constant dense<0.000000e+00> : vector<21xf32>
    %65 = vector.multi_reduction <add>, %64, %cst_47 [1] : vector<21x128xf32> to vector<21xf32>
    %66 = vector.shape_cast %65 : vector<21xf32> to vector<21x1xf32>
    %cst_48 = arith.constant 1.280000e+02 : f32
    %67 = vector.broadcast %cst_48 : f32 to vector<21x1xf32>
    %68 = arith.divf %66, %67 : vector<21x1xf32>
    %69 = vector.broadcast %61 : vector<21x1xf32> to vector<21x128xf32>
    %70 = arith.subf %57, %69 : vector<21x128xf32>
    %cst_49 = arith.constant 9.99999974E-6 : f32
    %71 = vector.broadcast %cst_49 : f32 to vector<21x1xf32>
    %72 = arith.addf %68, %71 : vector<21x1xf32>
    %73 = math.rsqrt %72 : vector<21x1xf32>
    %74 = vector.broadcast %73 : vector<21x1xf32> to vector<21x128xf32>
    %75 = arith.mulf %70, %74 : vector<21x128xf32>
    %76 = vector.broadcast %4 : vector<1x128xf32> to vector<21x128xf32>
    %77 = arith.mulf %75, %76 : vector<21x128xf32>
    %78 = vector.broadcast %6 : vector<1x128xf32> to vector<21x128xf32>
    %79 = arith.addf %77, %78 : vector<21x128xf32>
    %80 = arith.truncf %79 : vector<21x128xf32> to vector<21x128xbf16>
    %cst_50 = arith.constant dense<0.000000e+00> : vector<21x384xf32>
    %81 = tpu.matmul %80, %8, %cst_50 {dimension_numbers = #tpu.dot_dimension_numbers<[1], [0], [0], [1], [0, 0, 1, 1], [], []>} : vector<21x128xbf16>, vector<128x384xbf16>, vector<21x384xf32> -> vector<21x384xf32>
    %82 = vector.broadcast %10 : vector<1x384xf32> to vector<21x384xf32>
    %83 = arith.addf %81, %82 : vector<21x384xf32>
    %84 = vector.extract_strided_slice %83 {offsets = [0, 0], sizes = [21, 128], strides = [1, 1]} : vector<21x384xf32> to vector<21x128xf32>
    %cst_51 = arith.constant 1.250000e-01 : f32
    %85 = vector.broadcast %cst_51 : f32 to vector<21x128xf32>
    %86 = arith.mulf %84, %85 : vector<21x128xf32>
    %87 = arith.truncf %86 : vector<21x128xf32> to vector<21x128xbf16>
    %88 = vector.extract_strided_slice %83 {offsets = [0, 128], sizes = [21, 128], strides = [1, 1]} : vector<21x384xf32> to vector<21x128xf32>
    %89 = arith.truncf %88 : vector<21x128xf32> to vector<21x128xbf16>
    %90 = vector.extract_strided_slice %83 {offsets = [0, 256], sizes = [21, 128], strides = [1, 1]} : vector<21x384xf32> to vector<21x128xf32>
    %91 = arith.truncf %90 : vector<21x128xf32> to vector<21x128xbf16>
    %cst_52 = arith.constant 0.000000e+00 : f32
    %92 = vector.broadcast %cst_52 : f32 to vector<21x128xf32>
    %93 = vector.extract_strided_slice %87 {offsets = [0, 0], sizes = [21, 64], strides = [1, 1]} : vector<21x128xbf16> to vector<21x64xbf16>
    %94 = vector.extract_strided_slice %89 {offsets = [0, 0], sizes = [21, 64], strides = [1, 1]} : vector<21x128xbf16> to vector<21x64xbf16>
    %cst_53 = arith.constant dense<0.000000e+00> : vector<21x21xf32>
    %95 = tpu.matmul %93, %94, %cst_53 {dimension_numbers = #tpu.dot_dimension_numbers<[1], [1], [0], [0], [0, 0, 1, 0], [], []>} : vector<21x64xbf16>, vector<21x64xbf16>, vector<21x21xf32> -> vector<21x21xf32>
    %96 = arith.addf %95, %55 : vector<21x21xf32>
    %cst_54 = arith.constant dense<0xFF800000> : vector<21xf32>
    %97 = vector.multi_reduction <maximumf>, %96, %cst_54 [1] : vector<21x21xf32> to vector<21xf32>
    %98 = vector.shape_cast %97 : vector<21xf32> to vector<21x1xf32>
    %99 = vector.broadcast %98 : vector<21x1xf32> to vector<21x21xf32>
    %100 = arith.subf %96, %99 : vector<21x21xf32>
    %101 = math.exp %100 : vector<21x21xf32>
    %cst_55 = arith.constant dense<0.000000e+00> : vector<21xf32>
    %102 = vector.multi_reduction <add>, %101, %cst_55 [1] : vector<21x21xf32> to vector<21xf32>
    %103 = vector.shape_cast %102 : vector<21xf32> to vector<21x1xf32>
    %104 = tpu.reciprocal %103 {approx = true} : vector<21x1xf32> -> vector<21x1xf32>
    %105 = vector.broadcast %104 : vector<21x1xf32> to vector<21x21xf32>
    %106 = arith.mulf %101, %105 : vector<21x21xf32>
    %107 = arith.truncf %106 : vector<21x21xf32> to vector<21x21xbf16>
    %108 = vector.extract_strided_slice %91 {offsets = [0, 0], sizes = [21, 64], strides = [1, 1]} : vector<21x128xbf16> to vector<21x64xbf16>
    %cst_56 = arith.constant dense<0.000000e+00> : vector<21x64xf32>
    %109 = tpu.matmul %107, %108, %cst_56 {dimension_numbers = #tpu.dot_dimension_numbers<[1], [0], [0], [1], [0, 0, 1, 1], [], []>} : vector<21x21xbf16>, vector<21x64xbf16>, vector<21x64xf32> -> vector<21x64xf32>
    %110 = arith.truncf %109 : vector<21x64xf32> to vector<21x64xbf16>
    %111 = vector.extract_strided_slice %12 {offsets = [0, 0], sizes = [64, 128], strides = [1, 1]} : vector<128x128xbf16> to vector<64x128xbf16>
    %cst_57 = arith.constant dense<0.000000e+00> : vector<21x128xf32>
    %112 = tpu.matmul %110, %111, %cst_57 {dimension_numbers = #tpu.dot_dimension_numbers<[1], [0], [0], [1], [0, 0, 1, 1], [], []>} : vector<21x64xbf16>, vector<64x128xbf16>, vector<21x128xf32> -> vector<21x128xf32>
    %113 = arith.addf %92, %112 : vector<21x128xf32>
    %114 = vector.extract_strided_slice %87 {offsets = [0, 64], sizes = [21, 64], strides = [1, 1]} : vector<21x128xbf16> to vector<21x64xbf16>
    %115 = vector.extract_strided_slice %89 {offsets = [0, 64], sizes = [21, 64], strides = [1, 1]} : vector<21x128xbf16> to vector<21x64xbf16>
    %cst_58 = arith.constant dense<0.000000e+00> : vector<21x21xf32>
    %116 = tpu.matmul %114, %115, %cst_58 {dimension_numbers = #tpu.dot_dimension_numbers<[1], [1], [0], [0], [0, 0, 1, 0], [], []>} : vector<21x64xbf16>, vector<21x64xbf16>, vector<21x21xf32> -> vector<21x21xf32>
    %117 = arith.addf %116, %55 : vector<21x21xf32>
    %cst_59 = arith.constant dense<0xFF800000> : vector<21xf32>
    %118 = vector.multi_reduction <maximumf>, %117, %cst_59 [1] : vector<21x21xf32> to vector<21xf32>
    %119 = vector.shape_cast %118 : vector<21xf32> to vector<21x1xf32>
    %120 = vector.broadcast %119 : vector<21x1xf32> to vector<21x21xf32>
    %121 = arith.subf %117, %120 : vector<21x21xf32>
    %122 = math.exp %121 : vector<21x21xf32>
    %cst_60 = arith.constant dense<0.000000e+00> : vector<21xf32>
    %123 = vector.multi_reduction <add>, %122, %cst_60 [1] : vector<21x21xf32> to vector<21xf32>
    %124 = vector.shape_cast %123 : vector<21xf32> to vector<21x1xf32>
    %125 = tpu.reciprocal %124 {approx = true} : vector<21x1xf32> -> vector<21x1xf32>
    %126 = vector.broadcast %125 : vector<21x1xf32> to vector<21x21xf32>
    %127 = arith.mulf %122, %126 : vector<21x21xf32>
    %128 = arith.truncf %127 : vector<21x21xf32> to vector<21x21xbf16>
    %129 = vector.extract_strided_slice %91 {offsets = [0, 64], sizes = [21, 64], strides = [1, 1]} : vector<21x128xbf16> to vector<21x64xbf16>
    %cst_61 = arith.constant dense<0.000000e+00> : vector<21x64xf32>
    %130 = tpu.matmul %128, %129, %cst_61 {dimension_numbers = #tpu.dot_dimension_numbers<[1], [0], [0], [1], [0, 0, 1, 1], [], []>} : vector<21x21xbf16>, vector<21x64xbf16>, vector<21x64xf32> -> vector<21x64xf32>
    %131 = arith.truncf %130 : vector<21x64xf32> to vector<21x64xbf16>
    %132 = vector.extract_strided_slice %12 {offsets = [64, 0], sizes = [64, 128], strides = [1, 1]} : vector<128x128xbf16> to vector<64x128xbf16>
    %cst_62 = arith.constant dense<0.000000e+00> : vector<21x128xf32>
    %133 = tpu.matmul %131, %132, %cst_62 {dimension_numbers = #tpu.dot_dimension_numbers<[1], [0], [0], [1], [0, 0, 1, 1], [], []>} : vector<21x64xbf16>, vector<64x128xbf16>, vector<21x128xf32> -> vector<21x128xf32>
    %134 = arith.addf %113, %133 : vector<21x128xf32>
    %135 = arith.addf %57, %134 : vector<21x128xf32>
    %136 = vector.broadcast %14 : vector<1x128xf32> to vector<21x128xf32>
    %137 = arith.addf %135, %136 : vector<21x128xf32>
    %cst_63 = arith.constant dense<0.000000e+00> : vector<21xf32>
    %138 = vector.multi_reduction <add>, %137, %cst_63 [1] : vector<21x128xf32> to vector<21xf32>
    %139 = vector.shape_cast %138 : vector<21xf32> to vector<21x1xf32>
    %cst_64 = arith.constant 1.280000e+02 : f32
    %140 = vector.broadcast %cst_64 : f32 to vector<21x1xf32>
    %141 = arith.divf %139, %140 : vector<21x1xf32>
    %142 = vector.broadcast %141 : vector<21x1xf32> to vector<21x128xf32>
    %143 = arith.subf %137, %142 : vector<21x128xf32>
    %144 = arith.mulf %143, %143 : vector<21x128xf32>
    %cst_65 = arith.constant dense<0.000000e+00> : vector<21xf32>
    %145 = vector.multi_reduction <add>, %144, %cst_65 [1] : vector<21x128xf32> to vector<21xf32>
    %146 = vector.shape_cast %145 : vector<21xf32> to vector<21x1xf32>
    %cst_66 = arith.constant 1.280000e+02 : f32
    %147 = vector.broadcast %cst_66 : f32 to vector<21x1xf32>
    %148 = arith.divf %146, %147 : vector<21x1xf32>
    %149 = vector.broadcast %141 : vector<21x1xf32> to vector<21x128xf32>
    %150 = arith.subf %137, %149 : vector<21x128xf32>
    %cst_67 = arith.constant 9.99999974E-6 : f32
    %151 = vector.broadcast %cst_67 : f32 to vector<21x1xf32>
    %152 = arith.addf %148, %151 : vector<21x1xf32>
    %153 = math.rsqrt %152 : vector<21x1xf32>
    %154 = vector.broadcast %153 : vector<21x1xf32> to vector<21x128xf32>
    %155 = arith.mulf %150, %154 : vector<21x128xf32>
    %156 = vector.broadcast %16 : vector<1x128xf32> to vector<21x128xf32>
    %157 = arith.mulf %155, %156 : vector<21x128xf32>
    %158 = vector.broadcast %18 : vector<1x128xf32> to vector<21x128xf32>
    %159 = arith.addf %157, %158 : vector<21x128xf32>
    %160 = arith.truncf %159 : vector<21x128xf32> to vector<21x128xbf16>
    %cst_68 = arith.constant dense<0.000000e+00> : vector<21x256xf32>
    %161 = tpu.matmul %160, %20, %cst_68 {dimension_numbers = #tpu.dot_dimension_numbers<[1], [0], [0], [1], [0, 0, 1, 1], [], []>} : vector<21x128xbf16>, vector<128x256xbf16>, vector<21x256xf32> -> vector<21x256xf32>
    %162 = vector.broadcast %22 : vector<1x256xf32> to vector<21x256xf32>
    %163 = arith.addf %161, %162 : vector<21x256xf32>
    %cst_69 = arith.constant 0.000000e+00 : f32
    %164 = vector.broadcast %cst_69 : f32 to vector<21x256xf32>
    %165 = arith.maximumf %163, %164 : vector<21x256xf32>
    %166 = arith.truncf %165 : vector<21x256xf32> to vector<21x256xbf16>
    %cst_70 = arith.constant dense<0.000000e+00> : vector<21x128xf32>
    %167 = tpu.matmul %166, %24, %cst_70 {dimension_numbers = #tpu.dot_dimension_numbers<[1], [0], [0], [1], [0, 0, 1, 1], [], []>} : vector<21x256xbf16>, vector<256x128xbf16>, vector<21x128xf32> -> vector<21x128xf32>
    %168 = vector.broadcast %26 : vector<1x128xf32> to vector<21x128xf32>
    %169 = arith.addf %167, %168 : vector<21x128xf32>
    %170 = arith.addf %137, %169 : vector<21x128xf32>
    %c0_71 = arith.constant 0 : index
    %c0_72 = arith.constant 0 : index
    %c0_73 = arith.constant 0 : index
    %171 = vector.load %arg19[%c0_71, %c0_72, %c0_73] : memref<1x21x128xf32, #tpu.memory_space<vmem>>, vector<1x21x128xf32>
    %172 = vector.shape_cast %171 : vector<1x21x128xf32> to vector<21x128xf32>
    %173 = vector.shape_cast %170 : vector<21x128xf32> to vector<1x21x128xf32>
    tpu.vector_store %arg19[%c0_71, %c0_72, %c0_73], %173 {strides = array<i32>} : memref<1x21x128xf32, #tpu.memory_space<vmem>>, vector<1x21x128xf32>,
    %c1_i32_74 = arith.constant 1 : i32
    %174 = arith.cmpi eq, %arg1, %c1_i32_74 : i32
    %175 = arith.extui %174 : i1 to i32
    %c0_i32_75 = arith.constant 0 : i32
    %176 = arith.cmpi ne, %175, %c0_i32_75 : i32
    scf.if %176 {
      %177 = arith.truncf %170 : vector<21x128xf32> to vector<21x128xbf16>
      %c0_76 = arith.constant 0 : index
      %c0_77 = arith.constant 0 : index
      %178 = vector.load %arg16[%c0_76, %c0_77] : memref<128x128xbf16, #tpu.memory_space<vmem>>, vector<128x128xbf16>
      %cst_78 = arith.constant dense<0.000000e+00> : vector<21x128xf32>
      %179 = tpu.matmul %177, %178, %cst_78 {dimension_numbers = #tpu.dot_dimension_numbers<[1], [0], [0], [1], [0, 0, 1, 1], [], []>} : vector<21x128xbf16>, vector<128x128xbf16>, vector<21x128xf32> -> vector<21x128xf32>
      %c0_79 = arith.constant 0 : index
      %c0_80 = arith.constant 0 : index
      %180 = vector.load %arg17[%c0_79, %c0_80] : memref<1x128xf32, #tpu.memory_space<vmem>>, vector<1x128xf32>
      %181 = vector.broadcast %180 : vector<1x128xf32> to vector<21x128xf32>
      %182 = arith.addf %179, %181 : vector<21x128xf32>
      %c0_81 = arith.constant 0 : index
      %c0_82 = arith.constant 0 : index
      %c0_83 = arith.constant 0 : index
      %183 = vector.load %arg18[%c0_81, %c0_82, %c0_83] : memref<1x21x128xf32, #tpu.memory_space<vmem>>, vector<1x21x128xf32>
      %184 = vector.shape_cast %183 : vector<1x21x128xf32> to vector<21x128xf32>
      %185 = vector.shape_cast %182 : vector<21x128xf32> to vector<1x21x128xf32>
      tpu.vector_store %arg18[%c0_81, %c0_82, %c0_83], %185 {strides = array<i32>} : memref<1x21x128xf32, #tpu.memory_space<vmem>>, vector<1x21x128xf32>,
    } else {
    }
    return
  }
  func.func @transform_0(%arg0: i32, %arg1: i32, %arg2: memref<2x2xi32, #tpu.memory_space<smem>>) -> (i32, i32, i32) {
    %c0_i32 = arith.constant 0 : i32
    %c0_i32_0 = arith.constant 0 : i32
    %c0_i32_1 = arith.constant 0 : i32
    return %arg0, %c0_i32, %c0_i32_0 : i32, i32, i32
  }
  func.func @transform_1(%arg0: i32, %arg1: i32, %arg2: memref<2x2xi32, #tpu.memory_space<smem>>) -> (i32, i32, i32) {
    %c0_i32 = arith.constant 0 : i32
    %c0_i32_0 = arith.constant 0 : i32
    %c0_i32_1 = arith.constant 0 : i32
    return %arg1, %c0_i32, %c0_i32_0 : i32, i32, i32
  }
  func.func @transform_2(%arg0: i32, %arg1: i32, %arg2: memref<2x2xi32, #tpu.memory_space<smem>>) -> (i32, i32, i32) {
    %c0_i32 = arith.constant 0 : i32
    %c0_i32_0 = arith.constant 0 : i32
    %c0_i32_1 = arith.constant 0 : i32
    return %arg1, %c0_i32, %c0_i32_0 : i32, i32, i32
  }
  func.func @transform_3(%arg0: i32, %arg1: i32, %arg2: memref<2x2xi32, #tpu.memory_space<smem>>) -> (i32, i32, i32) {
    %c0_i32 = arith.constant 0 : i32
    %c0_i32_0 = arith.constant 0 : i32
    %c0_i32_1 = arith.constant 0 : i32
    return %arg1, %c0_i32, %c0_i32_0 : i32, i32, i32
  }
  func.func @transform_4(%arg0: i32, %arg1: i32, %arg2: memref<2x2xi32, #tpu.memory_space<smem>>) -> (i32, i32, i32) {
    %c0_i32 = arith.constant 0 : i32
    %c0_i32_0 = arith.constant 0 : i32
    %c0_i32_1 = arith.constant 0 : i32
    return %arg1, %c0_i32, %c0_i32_0 : i32, i32, i32
  }
  func.func @transform_5(%arg0: i32, %arg1: i32, %arg2: memref<2x2xi32, #tpu.memory_space<smem>>) -> (i32, i32, i32) {
    %c0_i32 = arith.constant 0 : i32
    %c0_i32_0 = arith.constant 0 : i32
    %c0_i32_1 = arith.constant 0 : i32
    return %arg1, %c0_i32, %c0_i32_0 : i32, i32, i32
  }
  func.func @transform_6(%arg0: i32, %arg1: i32, %arg2: memref<2x2xi32, #tpu.memory_space<smem>>) -> (i32, i32, i32) {
    %c0_i32 = arith.constant 0 : i32
    %c0_i32_0 = arith.constant 0 : i32
    %c0_i32_1 = arith.constant 0 : i32
    return %arg1, %c0_i32, %c0_i32_0 : i32, i32, i32
  }
  func.func @transform_7(%arg0: i32, %arg1: i32, %arg2: memref<2x2xi32, #tpu.memory_space<smem>>) -> (i32, i32, i32) {
    %c0_i32 = arith.constant 0 : i32
    %c0_i32_0 = arith.constant 0 : i32
    %c0_i32_1 = arith.constant 0 : i32
    return %arg1, %c0_i32, %c0_i32_0 : i32, i32, i32
  }
  func.func @transform_8(%arg0: i32, %arg1: i32, %arg2: memref<2x2xi32, #tpu.memory_space<smem>>) -> (i32, i32, i32) {
    %c0_i32 = arith.constant 0 : i32
    %c0_i32_0 = arith.constant 0 : i32
    %c0_i32_1 = arith.constant 0 : i32
    return %arg1, %c0_i32, %c0_i32_0 : i32, i32, i32
  }
  func.func @transform_9(%arg0: i32, %arg1: i32, %arg2: memref<2x2xi32, #tpu.memory_space<smem>>) -> (i32, i32, i32) {
    %c0_i32 = arith.constant 0 : i32
    %c0_i32_0 = arith.constant 0 : i32
    %c0_i32_1 = arith.constant 0 : i32
    return %arg1, %c0_i32, %c0_i32_0 : i32, i32, i32
  }
  func.func @transform_10(%arg0: i32, %arg1: i32, %arg2: memref<2x2xi32, #tpu.memory_space<smem>>) -> (i32, i32, i32) {
    %c0_i32 = arith.constant 0 : i32
    %c0_i32_0 = arith.constant 0 : i32
    %c0_i32_1 = arith.constant 0 : i32
    return %arg1, %c0_i32, %c0_i32_0 : i32, i32, i32
  }
  func.func @transform_11(%arg0: i32, %arg1: i32, %arg2: memref<2x2xi32, #tpu.memory_space<smem>>) -> (i32, i32, i32) {
    %c0_i32 = arith.constant 0 : i32
    %c0_i32_0 = arith.constant 0 : i32
    %c0_i32_1 = arith.constant 0 : i32
    return %arg1, %c0_i32, %c0_i32_0 : i32, i32, i32
  }
  func.func @transform_12(%arg0: i32, %arg1: i32, %arg2: memref<2x2xi32, #tpu.memory_space<smem>>) -> (i32, i32, i32) {
    %c0_i32 = arith.constant 0 : i32
    %c0_i32_0 = arith.constant 0 : i32
    %c0_i32_1 = arith.constant 0 : i32
    return %arg1, %c0_i32, %c0_i32_0 : i32, i32, i32
  }
  func.func @transform_13(%arg0: i32, %arg1: i32, %arg2: memref<2x2xi32, #tpu.memory_space<smem>>) -> (i32, i32) {
    %c0_i32 = arith.constant 0 : i32
    %c0_i32_0 = arith.constant 0 : i32
    %c0_i32_1 = arith.constant 0 : i32
    return %c0_i32, %c0_i32_0 : i32, i32
  }
  func.func @transform_14(%arg0: i32, %arg1: i32, %arg2: memref<2x2xi32, #tpu.memory_space<smem>>) -> (i32, i32) {
    %c0_i32 = arith.constant 0 : i32
    %c0_i32_0 = arith.constant 0 : i32
    %c0_i32_1 = arith.constant 0 : i32
    return %c0_i32, %c0_i32_0 : i32, i32
  }
  func.func @transform_15(%arg0: i32, %arg1: i32, %arg2: memref<2x2xi32, #tpu.memory_space<smem>>) -> (i32, i32, i32) {
    %c0_i32 = arith.constant 0 : i32
    %c0_i32_0 = arith.constant 0 : i32
    %c0_i32_1 = arith.constant 0 : i32
    return %arg0, %c0_i32, %c0_i32_0 : i32, i32, i32
  }
}

</mosaic_0001>

<bundles_post_ra>
// kernel: tpu_custom_call.1
= control target key start
LH: loop header
LB: loop body
LE: loop exit
PB: predicated region body
PF: predicated region fallthrough
CT: control target
= control target key end

     0   :  { %s3831_s0 = inlined_call_operand.vmem [shape: s32[2,2], index: 0, kind: input, shape index: {}]   ;;  %s3832_s1 = inlined_call_operand.vmem [shape: f32[2,21,128], index: 1, kind: input, shape index: {}]   ;;  %s3833_s2 = inlined_call_operand.vmem [shape: f32[2,1,128], index: 2, kind: input, shape index: {}]   ;;  %s3834_s3 = inlined_call_operand.vmem [shape: f32[2,1,128], index: 3, kind: input, shape index: {}]   ;;  %s3835_s4 = inlined_call_operand.hbm [shape: bf16[2,128,384], index: 4, kind: input, shape index: {}]   ;;  %s3836_s5 = inlined_call_operand.vmem [shape: f32[2,1,384], index: 5, kind: input, shape index: {}]   ;;  %s3837_s6 = inlined_call_operand.hbm [shape: bf16[2,128,128], index: 6, kind: input, shape index: {}]   ;;  %s3838_s7 = inlined_call_operand.vmem [shape: f32[2,1,128], index: 7, kind: input, shape index: {}]   ;;  %s3839_s8 = inlined_call_operand.vmem [shape: f32[2,1,128], index: 8, kind: input, shape index: {}]   ;;  %s3840_s9 = inlined_call_operand.vmem [shape: f32[2,1,128], index: 9, kind: input, shape index: {}]   ;;  %s3841_s10 = inlined_call_operand.hbm [shape: bf16[2,128,256], index: 10, kind: input, shape index: {}]   ;;  %s3842_s11 = inlined_call_operand.vmem [shape: f32[2,1,256], index: 11, kind: input, shape index: {}]   ;;  %s3843_s12 = inlined_call_operand.hbm [shape: bf16[2,256,128], index: 12, kind: input, shape index: {}]   ;;  %s3844_s13 = inlined_call_operand.vmem [shape: f32[2,1,128], index: 13, kind: input, shape index: {}]   ;;  %s3845_s14 = inlined_call_operand.vmem [shape: bf16[128,128], index: 14, kind: input, shape index: {}]   ;;  %s3846_s15 = inlined_call_operand.vmem [shape: f32[1,128], index: 15, kind: input, shape index: {}]   ;;  %s3847_s16 = inlined_call_operand.vmem [shape: f32[2,21,128], index: 16, kind: output, shape index: {}]  }
   0x1   :  { %3862 = sst [smem:[#allocation26_spill]] %s3831_s0 }
   0x2   :  { %3863 = sst [smem:[#allocation27_spill]] %s3832_s1 }
   0x3   :  { %3864 = sst [smem:[#allocation28_spill]] %s3835_s4 }
   0x4   :  { %3865 = sst [smem:[#allocation29_spill]] %s3836_s5 }
   0x5   :  { %3866 = sst [smem:[#allocation30_spill]] %s3837_s6 }
   0x6   :  { %3867 = sst [smem:[#allocation31_spill]] %s3838_s7 }
   0x7   :  { %3868 = sst [smem:[#allocation32_spill]] %s3839_s8 }
   0x8   :  { %3869 = sst [smem:[#allocation33_spill]] %s3840_s9 }
   0x9   :  { %3870 = sst [smem:[#allocation34_spill]] %s3841_s10 }
   0xa   :  { %3871 = sst [smem:[#allocation35_spill]] %s3842_s11 }
   0xb   :  { %3872 = sst [smem:[#allocation36_spill]] %s3843_s12 }
   0xc   :  { %3873 = sst [smem:[#allocation37_spill]] %s3844_s13 }
   0xd   :  { %3874 = sst [smem:[#allocation38_spill]] %s3845_s14 }
   0xe   :  { %3875 = sst [smem:[#allocation39_spill]] %s3846_s15 }
   0xf   :  { %3876 = sst [smem:[#allocation40_spill]] %s3847_s16 }
  0x10   :  { %s3877_s23 = sld [smem:[#allocation26_spill]] }
  0x16   :  { %s21_s9 = sshll.u32 %s3877_s23, 4  ;;  %s22_s9 = int_to_ptr.vmem [resolvable:$true] %s21_s9 }
  0x17   :  { %s2998_s24 = scalar_lea.vmem %s22_s9, 32  ;;  %p3003_p1 = scmp.lt.s32.totalorder %s22_s9, %s22_s9 }
  0x18   :  { %p2999_p0 = scmp.ne.s32.totalorder %s22_s9, %s2998_s24  ;;  %p3004_p2 = scmp.lt.s32.totalorder %s2998_s24, %s2998_s24 }
  0x1a   :  { %p3005_p3 = por %p3004_p2, %p3003_p1 }
  0x1c   :  { %p3006_p4 = pnand %p3005_p3, %p2999_p0 }
  0x1e   :  { %3009 = shalt.err (!%p3006_p4)  }
  0x1f   :  { %s3200_s25 = smov [#allocation4]  }
  0x20   :  { %24 = dma.vmem_to_smem %s22_s9, 32, %s3200_s25, [#allocation3] }
  0x21   :  { %3154 = dma.done.wait [#allocation3], 32 }
  0x22   :  { %3155 = vsyncadd [#allocation3], 4294967264 }
  0x23   :  { %26 = sfence }
  0x24   :  { %27 = vsyncpa [#allocation6], 0 }
  0x25   :  { %29 = vsyncpa [#allocation6 + $0x1], 0 }
  0x26   :  { %30 = vsyncpa [#allocation8], 0 }
  0x27   :  { %32 = vsyncpa [#allocation8 + $0x1], 0 }
  0x28   :  { %33 = vsyncpa [#allocation11], 0 }
  0x29   :  { %35 = vsyncpa [#allocation11 + $0x1], 0  ;;  %s3303_s26 = smov 0   ;;  %s3305_s27 = smov 0  }
  0x2a   :  { %s3307_s28 = smov 0   ;;  %s3309_s29 = smov 0  }
  0x2b   :  { %s3311_s30 = smov 0   ;;  %s3313_s9 = smov 0  }
  0x2c   :  { %s3315_s0 = smov 0   ;;  %s3317_s17 = smov 0  }
  0x2d LB: > { %3878 = sst [smem:[#allocation16_spill]] %s3174_s27  ;;  %s3850_s18 = sadd.s32 4294967295, %s3198_s17   ;;  %s3198_s17 = sphi %s3317_s17, %s41_s17   ;;  %s3194_s0 = sphi %s3315_s0, %s3936_s0   ;;  %s3190_s9 = sphi %s3313_s9, %s3935_s9   ;;  %s3186_s30 = sphi %s3311_s30, %s3934_s30   ;;  %s3182_s29 = sphi %s3309_s29, %s3933_s29   ;;  %s3178_s28 = sphi %s3307_s28, %s3932_s28   ;;  %s3174_s27 = sphi %s3305_s27, %s3931_s27   ;;  %s3170_s26 = sphi %s3303_s26, %s3930_s26  }
  0x2e   : > { %3879 = sst [smem:[#allocation17_spill]] %s3178_s28  ;;  %s50_s19 = sadd.s32 1, %s3190_s9 }
  0x2f   : > { %3880 = sst [smem:[#allocation18_spill]] %s3190_s9  ;;  %p51_p5 = scmp.ge.s32.totalorder %s50_s19, 2 }
  0x30   : > { %3881 = sst [smem:[#allocation19_spill]] %s3194_s0  ;;  %s53_s20 = sadd.s32 1, %s3194_s0 }
  0x31   : > { %3882 = sst [smem:[#allocation20_spill]] %s3198_s17  ;;  %s138_s21 = sadd.s32 1, %s3178_s28 }
  0x32   : > { %p145_p6 = scmp.ne.s32.totalorder %s3178_s28, %s3174_s27  ;;  %s3938_s19 = smov (%p51_p5, %s50_s19), 0 }
  0x33   : > { %3883 = sst [smem:[#allocation21_spill]] %s3938_s19  ;;  %s3940_s20 = smov (!%p51_p5, %s53_s20), %s3194_s0 }
  0x34   : > { %s135_s22 = ssub.s32 %s3190_s9, %s3938_s19  ;;  %p146_p7 = scmp.eq.s32.totalorder %s3198_s17, 0 }
  0x35   : > { %p55_p8 = scmp.ge.s32.totalorder %s3940_s20, 2  ;;  %p136_p9 = scmp.eq.s32.totalorder %s135_s22, 0 }
  0x36   : > { %p147_p10 = por %p146_p7, %p145_p6  ;;  %p151_p11 = scmp.ne.s32.totalorder %s3174_s27, %s3170_s26 }
  0x37   : > { %s3942_s20 = smov (%p55_p8, %s3940_s20), 0  ;;  %p152_p12 = scmp.eq.s32.totalorder %s3850_s18, 0 }
  0x38   : > { %3884 = sst [smem:[#allocation22_spill]] %s3942_s20  ;;  %p2798_p13 = scmp.lt.s32.totalorder %s3198_s17, 4 }
  0x39   : > { %s3357_s23 = scalar_select %p136_p9, %s3178_s28, %s138_s21  }
  0x3a   : > { %s3363_s24 = sand.u32 1, %s3178_s28   ;;  %p3365_p0 = por %p152_p12, %p151_p11 }
  0x3b   : > { %3885 = sst [smem:[#allocation23_spill]] %s3357_s23  ;;  %s531_s19 = sand.u32 1, %s3198_s17  }
  0x3c   : > { %p3370_p1 = pnand %p2798_p13, %p147_p10  ;;  %s2480_s26 = sshll.u32 %s3363_s24, 6 }
  0x3d   : > { %s2593_s21 = sshll.u32 %s3190_s9, 10  ;;  %s3888_s6 = sld [smem:[#allocation30_spill]] }
  0x3e   : > { %s535_s23 = scalar_lea.vmem [#allocation7], %s2480_s26  ;;  %p2489_p2 = scmp.ge.s32.totalorder %s3198_s17, 1 }
  0x3f   : > { %s542_s28 = sshll.u32 %s535_s23, 4  ;;  %s3380_s15 = scalar_lea.sflag [#allocation8], %s531_s19  ;;  %s543_s28 = int_to_ptr.vmem [resolvable:$true] %s542_s28 }
  0x40   : > { %p3012_p3 = pneg %p3370_p1  ;;  %s3023_s14 = scalar_lea.vmem %s543_s28, 1024 }
  0x41   : > { %p3024_p4 = scmp.ne.s32.totalorder %s543_s28, %s3023_s14  ;;  %s3201_s16 = smov [#allocation7]  }
  0x42   : > { %s3028_s11 = sshll.u32 %s3201_s16, 4  ;;  %s3029_s11 = int_to_ptr.vmem [resolvable:$false] %s3028_s11 }
  0x43   : > { %s541_s18 = scalar_lea.hbm %s3888_s6, %s2593_s21  ;;  %p3026_p5 = pnand %p3024_p4, %p3012_p3 }
  0x44   : > { %s3030_s13 = scalar_lea.vmem %s3029_s11, 2048  ;;  %p3031_p7 = scmp.lt.s32.totalorder %s543_s28, %s3029_s11 }
  0x45   : > { %p3027_p6 = pneg %p3026_p5  ;;  %p3032_p8 = scmp.lt.s32.totalorder %s3030_s13, %s3023_s14 }
  0x47   : > { %p3033_p9 = por %p3032_p8, %p3031_p7 }
  0x49   : > { %p3034_p10 = pnand %p3033_p9, %p3027_p6 }
  0x4b   : > { %3037 = shalt.err (!%p3034_p10)
}
  0x4c   : > { %s3853_s0 = smov 64   ;;  %s3854_s19 = smov 4  }
  0x4d   : > { %2791 = dma.hbm_to_vmem [thread:$0]  (!%p3370_p1), %s541_s18, 1024, %s543_s28, %s3380_s15, %s3853_s0, %s3853_s0, %s3854_s19  }
  0x4e   : > { %p623_p11 = scmp.lt.s32.totalorder %s3198_s17, 5  ;;  %s2772_s13 = smul.u32 192, %s3363_s24 }
  0x4f   : > { %s2773_s14 = smul.u32 3072, %s3190_s9  ;;  %s3890_s4 = sld [smem:[#allocation28_spill]] }
  0x50   : > { %p3396_p12 = pnand %p2489_p2, %p623_p11  ;;  %s507_s26 = scalar_lea.vmem [#allocation5], %s2772_s13 }
  0x51   : > { %s514_s21 = sshll.u32 %s507_s26, 4  ;;  %s2483_s6 = sshll.u32 %s3363_s24, 7  ;;  %s515_s21 = int_to_ptr.vmem [resolvable:$true] %s514_s21 }
  0x52   : > { %s504_s5 = scalar_lea.sflag [#allocation6], %s3363_s24  ;;  %s3051_s8 = scalar_lea.vmem %s515_s21, 3072 }
  0x53   : > { %p3052_p13 = scmp.ne.s32.totalorder %s515_s21, %s3051_s8  ;;  %s3204_s28 = smov [#allocation5]  }
  0x54   : > { %s3056_s18 = sshll.u32 %s3204_s28, 4  ;;  %s3057_s18 = int_to_ptr.vmem [resolvable:$false] %s3056_s18 }
  0x55   : > { %s513_s23 = scalar_lea.hbm %s3890_s4, %s2773_s14  ;;  %p3054_p4 = pnand %p3052_p13, %p3012_p3 }
  0x56   : > { %s3058_s0 = scalar_lea.vmem %s3057_s18, 6144  ;;  %p3059_p5 = scmp.lt.s32.totalorder %s515_s21, %s3057_s18 }
  0x57   : > { %p3055_p2 = pneg %p3054_p4  ;;  %p3060_p6 = scmp.lt.s32.totalorder %s3058_s0, %s3051_s8 }
  0x59   : > { %p3061_p7 = por %p3060_p6, %p3059_p5 }
  0x5b   : > { %p3062_p8 = pnand %p3061_p7, %p3055_p2 }
  0x5d   : > { %3065 = shalt.err (!%p3062_p8)
}
  0x5e   : > { %s3205_s13 = smov 192   ;;  %s3206_s14 = smov 12  }
  0x5f   : > { %2788 = dma.hbm_to_vmem [thread:$0]  (!%p3370_p1), %s513_s23, 3072, %s515_s21, %s504_s5, %s3205_s13, %s3205_s13, %s3206_s14  }
  0x60   : > { %s2594_s16 = sshll.u32 %s3190_s9, 11  ;;  %s3891_s10 = sld [smem:[#allocation34_spill]] }
  0x61   : > { %s574_s19 = scalar_lea.vmem [#allocation9], %s2483_s6  ;;  %s3207_s0 = smov [#allocation9]  }
  0x62   : > { %s581_s18 = sshll.u32 %s574_s19, 4  ;;  %s3084_s4 = sshll.u32 %s3207_s0, 4  ;;  %s582_s18 = int_to_ptr.vmem [resolvable:$true] %s581_s18  ;;  %s3085_s4 = int_to_ptr.vmem [resolvable:$false] %s3084_s4 }
  0x63   : > { %s3079_s8 = scalar_lea.vmem %s582_s18, 2048  ;;  %s3086_s7 = scalar_lea.vmem %s3085_s4, 4096 }
  0x64   : > { %p3080_p9 = scmp.ne.s32.totalorder %s582_s18, %s3079_s8  ;;  %p3087_p13 = scmp.lt.s32.totalorder %s582_s18, %s3085_s4 }
  0x65   : > { %p3088_p4 = scmp.lt.s32.totalorder %s3086_s7, %s3079_s8 }
  0x66   : > { %s580_s28 = scalar_lea.hbm %s3891_s10, %s2594_s16  ;;  %p3082_p10 = pnand %p3080_p9, %p3012_p3 }
  0x67   : > { %p3089_p2 = por %p3088_p4, %p3087_p13 }
  0x68   : > { %p3083_p11 = pneg %p3082_p10 }
  0x6a   : > { %p3090_p5 = pnand %p3089_p2, %p3083_p11 }
  0x6c   : > { %3093 = shalt.err (!%p3090_p5)
}
  0x6d   : > { %s3208_s5 = smov 128   ;;  %s3209_s19 = smov 8  }
  0x6e   : > { %2794 = dma.hbm_to_vmem [thread:$0]  (!%p3370_p1), %s580_s28, 2048, %s582_s18, %s3380_s15, %s3208_s5, %s3208_s5, %s3209_s19  }
  0x6f   : > { %s3892_s12 = sld [smem:[#allocation36_spill]]  ;;  %s602_s14 = scalar_lea.vmem [#allocation10], %s2483_s6 }
  0x70   : > { %s609_s4 = sshll.u32 %s602_s14, 4  ;;  %s599_s7 = scalar_lea.sflag [#allocation11], %s3363_s24  ;;  %s610_s4 = int_to_ptr.vmem [resolvable:$true] %s609_s4 }
  0x71   : > { %s3107_s20 = scalar_lea.vmem %s610_s4, 2048  ;;  %s3210_s26 = smov [#allocation10]  }
  0x72   : > { %p3108_p6 = scmp.ne.s32.totalorder %s610_s4, %s3107_s20  ;;  %s3112_s8 = sshll.u32 %s3210_s26, 4  ;;  %s3113_s8 = int_to_ptr.vmem [resolvable:$false] %s3112_s8 }
  0x73   : > { %s3114_s0 = scalar_lea.vmem %s3113_s8, 4096  ;;  %p3115_p9 = scmp.lt.s32.totalorder %s610_s4, %s3113_s8 }
  0x74   : > { %p3110_p7 = pnand %p3108_p6, %p3012_p3  ;;  %p3116_p10 = scmp.lt.s32.totalorder %s3114_s0, %s3107_s20 }
  0x75   : > { %s608_s13 = scalar_lea.hbm %s3892_s12, %s2594_s16 }
  0x76   : > { %p3111_p8 = pneg %p3110_p7  ;;  %p3117_p11 = por %p3116_p10, %p3115_p9 }
  0x78   : > { %p3118_p13 = pnand %p3117_p11, %p3111_p8 }
  0x7a   : > { %3121 = shalt.err (!%p3118_p13)
}
  0x7b   : > { %s3893_s6 = smov 4   ;;  %s3894_s15 = smov 64  }
  0x7c   : > { %2797 = dma.hbm_to_vmem [thread:$0]  (!%p3370_p1), %s608_s13, 2048, %s610_s4, %s599_s7, %s3894_s15, %s3894_s15, %s3893_s6  }
  0x7d   : > { %627 = sbr.rel (%p3396_p12) target bundleno = 3120 (0xc30), region = 80 }
  0x82   : > { %s629_s24 = sand.u32 1, %s3174_s27  }
  0x83   : > { %s2774_s16 = smul.u32 192, %s629_s24  ;;  %s630_s28 = scalar_lea.sflag [#allocation6], %s629_s24 }
  0x85   : > { %s3441_s18 = scalar_lea.vmem [#allocation5], %s2774_s16 }
  0x86   : > { %3157 = dma.done.wait (%p3365_p0), %s630_s28, 3072  }
  0x87   : > { %3159 = vsyncadd (%p3365_p0), %s630_s28, 4294964224  ;;  %s3895_s22 = sadd.s32 4294967295, %s3198_s17   ;;  %s2490_s19 = sshll.u32 %s629_s24, 6 }
  0x88   : > { %s638_s5 = sand.u32 1, %s3895_s22   ;;  %s3449_s11 = scalar_lea.vmem [#allocation7], %s2490_s19 }
  0x89   : > { %s639_s23 = scalar_lea.sflag [#allocation8], %s638_s5 }
  0x8a   : > { %3161 = dma.done.wait (%p3365_p0), %s639_s23, 3072  }
  0x8b   : > { %3163 = vsyncadd (%p3365_p0), %s639_s23, 4294964224  ;;  %s2491_s21 = sshll.u32 %s629_s24, 7  ;;  %s657_s14 = scalar_lea.sflag [#allocation11], %s629_s24 }
  0x8c   : > { %s3455_s13 = scalar_lea.vmem [#allocation9], %s2491_s21  ;;  %s3457_s4 = scalar_lea.vmem [#allocation10], %s2491_s21 }
  0x8d   : > { %3896 = sst [smem:[#allocation24_spill]] %s3455_s13 }
  0x8e   : > { %3897 = sst [smem:[#allocation25_spill]] %s3457_s4 }
  0x8f   : > { %3165 = dma.done.wait (%p3365_p0), %s657_s14, 2048  }
  0x90   : > { %3167 = vsyncadd (%p3365_p0), %s657_s14, 4294965248  ;;  %p753_p1 = scmp.lt.s32.totalorder %s3186_s30, 1  ;;  %p758_p3 = scmp.lt.s32.totalorder %s3182_s29, 1 }
  0x91   : > { %s3898_s1 = sld [smem:[#allocation27_spill]]  ;;  %p2496_p0 = scmp.ne.s32.totalorder %s3182_s29, 0 }
  0x92   : > { %s754_s7 = scalar_select %p753_p1, %s3186_s30, 1 }
  0x93   : > { %s3467_s20 = scalar_select %p758_p3, %s3182_s29, 1 }
  0x94   : > { %s2775_s26 = smul.u32 24, %s754_s7  ;;  %s3900_s7 = sld [smem:[#allocation32_spill]] }
  0x95   : > { %s2776_s5 = smul.u32 3, %s3467_s20  ;;  %s3901_s8 = sld [smem:[#allocation29_spill]] }
  0x96   : > { %s3902_s24 = sld [smem:[#allocation33_spill]]  ;;  %s2494_s16 = sshll.u32 %s3467_s20, 1 }
  0x97   : > { %s757_s22 = scalar_lea.vmem %s3898_s1, %s2775_s26  ;;  %s3903_s4 = sld [smem:[#allocation37_spill]] }
  0x98   : > { %s3904_s21 = sld [smem:[#allocation35_spill]] }
  0x9a   : > { %s773_s9 = scalar_lea.vmem %s3900_s7, %s3467_s20  ;;  %s3905_s7 = sld [smem:[#allocation40_spill]] }
  0x9b   : > { %s3492_s0 = scalar_lea.vmem %s3901_s8, %s2776_s5 }
  0x9c   : > { %s776_s17 = scalar_lea.vmem %s3902_s24, %s3467_s20  ;;  %793 = sbr.rel (%p2496_p0) target bundleno = 164 (0xa4), region = 100 }
  0x9d   : > { %s783_s13 = scalar_lea.vmem %s3903_s4, %s3467_s20 }
  0x9e   : > { %s3506_s14 = scalar_lea.vmem %s3904_s21, %s2494_s16 }
  0xa0   : > { %s3511_s27 = scalar_lea.vmem %s3905_s7, %s2775_s26 }
  0xa1   : > { %v794_v0 = vld [vmem:[%s757_s22] sm:$0xff]  ;;  %v795_v1 = vld [vmem:[%s757_s22 + $0x8] sm:$0xff]  ;;  %v796_v2 = vld [vmem:[%s757_s22 + $0x10] sm:$0x1f] }
  0xa2   : > { %797 = vst [vmem:[#allocation2 + $0x10] sm:$0xff] %v794_v0  ;;  %798 = vst [vmem:[#allocation2] sm:$0xff] %v795_v1 }
  0xa3   : > { %799 = vst [vmem:[#allocation2 + $0x8] sm:$0x1f] %v796_v2 }
  0xa4 PF: > { %vm3860_vm0 = vcmask 1044480   ;;  %v2874_v7 = vld [vmem:[%s3441_s18 + $0xac] ss:$12 sps:$4 sm:$0xff]   ;;  %v2876_v21 = vld [vmem:[%s3441_s18 + $0xa8] ss:$12 sps:$4 sm:$0xff]   ;;  %v3211_v37 = vmov 0   ;;  %s3906_s4 = scalar_lea.vmem %s3833_s2, %s3467_s20  ;;  %s3907_s22 = scalar_lea.vmem %s3834_s3, %s3467_s20 }
  0xa5   : > { %1140 = vmatprep.subr.bf16.mxu0 %v2874_v7  ;;  %v2877_v22 = vld [vmem:[%s3441_s18 + $0xb0] ss:$12 sps:$4 sm:$0xff]   ;;  %v2878_v23 = vld [vmem:[%s3441_s18 + $0x94] ss:$12 sps:$4 sm:$0xff]   ;;  %v2881_v25 = vld [vmem:[%s3441_s18 + $0x98] ss:$12 sps:$4 sm:$0xff]   ;;  %1172 = vmatprep.mubr.bf16.mxu0 %v3211_v37 }
  0xa6   : > { %1141 = vmatpush1.bf16.msra.mxu0 %v2876_v21  ;;  %2672 = vmatprep.subr.bf16.mxu1 %v2877_v22  ;;  %v2880_v24 = vld [vmem:[%s3441_s18 + $0x90] ss:$12 sps:$4 sm:$0xff]   ;;  %v2884_v27 = vld [vmem:[%s3441_s18 + $0x78] ss:$12 sps:$4 sm:$0xff]   ;;  %v2885_v28 = vld [vmem:[%s3441_s18 + $0x80] ss:$12 sps:$4 sm:$0xff]  }
  0xa7   : > { %2673 = vmatpush3.bf16.msra.mxu1 %v2877_v22  ;;  %1142 = vmatprep.subr.bf16.mxu0 %v2878_v23  ;;  %v2882_v26 = vld [vmem:[%s3441_s18 + $0x7c] ss:$12 sps:$4 sm:$0xff]   ;;  %v2886_v29 = vld [vmem:[%s3441_s18 + $0x64] ss:$12 sps:$4 sm:$0xff]   ;;  %v2888_v30 = vld [vmem:[%s3441_s18 + $0x60] ss:$12 sps:$4 sm:$0xff]  }
  0xa8   : > { %2674 = vmatprep.subr.bf16.mxu1 %v2881_v25  ;;  %v2889_v31 = vld [vmem:[%s3441_s18 + $0x68] ss:$12 sps:$4 sm:$0xff]   ;;  %v2890_v32 = vld [vmem:[%s3441_s18 + $0x4c] ss:$12 sps:$4 sm:$0xff]   ;;  %v2893_v33 = vld [vmem:[%s3441_s18 + $0x50] ss:$12 sps:$4 sm:$0xff]  }
  0xa9   : > { %v3514_v3 = vld [vmem:[#allocation2 + $0x10] sm:$0xff]  ;;  %v3518_v5 = vld [vmem:[#allocation2] sm:$0xff]  ;;  %v2894_v35 = vld [vmem:[%s3441_s18 + $0x34] ss:$12 sps:$4 sm:$0xff]   ;;  %vm1352_vm1 = vcmask 1041408   ;;  %vm1353_vm2 = vcmask 1042432  }
  0xaa   : > { %v3516_v4 = vld [vmem:[#allocation2 + $0x8] sm:$0x1f]  ;;  %939 = vadd.xlane.f32.xlu0 %v3514_v3  ;;  %1143 = vmatpush1.bf16.msra.mxu0 %v2880_v24  ;;  %v2897_v36 = vld [vmem:[%s3441_s18 + $0x38] ss:$12 sps:$4 sm:$0xff]   ;;  %v2898_v39 = vld [vmem:[%s3441_s18 + $0x1c] ss:$12 sps:$4 sm:$0xff]  }
  0xab   : > { %v944_v6 = vsel %vm3860_vm0, %v3516_v4, 0.0  ;;  %2675 = vmatpush3.bf16.msra.mxu1 %v2881_v25  ;;  %1144 = vmatprep.subr.bf16.mxu0 %v2882_v26  ;;  %v2892_v34 = vld [vmem:[%s3441_s18 + $0x48] ss:$12 sps:$4 sm:$0xff]   ;;  %v2896_v38 = vld [vmem:[%s3441_s18 + $0x30] ss:$12 sps:$4 sm:$0xff]   ;;  %vm3861_vm3 = vcmask 523264  }
  0xac   : > { %945 = vadd.xlane.f32.xlu1 %v944_v6  ;;  %2676 = vmatprep.subr.bf16.mxu1 %v2885_v28  ;;  %v2901_v40 = vld [vmem:[%s3441_s18 + $0x20] ss:$12 sps:$4 sm:$0xff]   ;;  %v2900_v41 = vld [vmem:[%s3441_s18 + $0x18] ss:$12 sps:$4 sm:$0xff]   ;;  %v2905_v43 = vld [vmem:[%s3441_s18 + $0x8] ss:$12 sps:$4 sm:$0xff]  }
  0xad   : > { %v2902_v42 = vld [vmem:[%s3441_s18 + $0x4] ss:$12 sps:$4 sm:$0xff]   ;;  %v2904_v44 = vld [vmem:[%s3441_s18] ss:$12 sps:$4 sm:$0xff]   ;;  %v2499_v56 = vld [vmem:[%s3906_s4] ss:$0 sm:$0xff] }
  0xae   : > { %941 = vadd.xlane.f32.xlu0 %v3518_v5  ;;  %1145 = vmatpush1.bf16.msra.mxu0 %v2884_v27  ;;  %v2500_v62 = vld [vmem:[%s3907_s22] ss:$0 sm:$0xff]  ;;  %s3919_s16 = sld [smem:[#allocation31_spill]]  ;;  %p2581_p12 = scmp.ne.s32.totalorder %s3182_s29, 1 }
  0xaf   : > { %2677 = vmatpush3.bf16.msra.mxu1 %v2885_v28  ;;  %1146 = vmatprep.subr.bf16.mxu0 %v2886_v29  ;;  %s3923_s19 = sld [smem:[#allocation25_spill]] }
  0xb0   : > { %2678 = vmatprep.subr.bf16.mxu1 %v2889_v31  ;;  %s3927_s18 = sld [smem:[#allocation38_spill]] (!%p2581_p12) }
  0xb1   : > { %s3928_s23 = sld [smem:[#allocation39_spill]] (!%p2581_p12) }
  0xb2   : > { %1147 = vmatpush1.bf16.msra.mxu0 %v2888_v30 }
  0xb3   : > { %2679 = vmatpush3.bf16.msra.mxu1 %v2889_v31  ;;  %1148 = vmatprep.subr.bf16.mxu0 %v2890_v32 }
  0xb4   : > { %2680 = vmatprep.subr.bf16.mxu1 %v2893_v33  ;;  %s3920_s28 = scalar_lea.vmem %s3919_s16, %s3467_s20 }
  0xb6   : > { %1149 = vmatpush1.bf16.msra.mxu0 %v2892_v34 }
  0xb7   : > { %2681 = vmatpush3.bf16.msra.mxu1 %v2893_v33  ;;  %1150 = vmatprep.subr.bf16.mxu0 %v2894_v35 }
  0xb8   : > { %2682 = vmatprep.subr.bf16.mxu1 %v2897_v36 }
  0xba   : > { %1151 = vmatpush1.bf16.msra.mxu0 %v2896_v38 }
  0xbb   : > { %2683 = vmatpush3.bf16.msra.mxu1 %v2897_v36  ;;  %1152 = vmatprep.subr.bf16.mxu0 %v2898_v39 }
  0xbc   : > { %2684 = vmatprep.subr.bf16.mxu1 %v2901_v40 }
  0xbe   : > { %1153 = vmatpush1.bf16.msra.mxu0 %v2900_v41 }
  0xbf   : > { %2685 = vmatpush3.bf16.msra.mxu1 %v2901_v40  ;;  %1154 = vmatprep.subr.bf16.mxu0 %v2902_v42 }
  0xc0   : > { %2686 = vmatprep.subr.bf16.mxu1 %v2905_v43 }
  0xc2   : > { %1155 = vmatpush1.bf16.msra.mxu0 %v2904_v44 }
  0xc3   : > { %2687 = vmatpush3.bf16.msra.mxu1 %v2905_v43 }
 0x133   : > { %v940_v8 = vpop.xlane.xlu0 %939 }
 0x134   : > { %v948_v9 = vmul.f32 0.0078125, %v940_v8 }
 0x135   : > { %v946_v10 = vpop.xlane.xlu1 %945 }
 0x136   : > { %v950_v11 = vmul.f32 0.0078125, %v946_v10  ;;  %v3526_v12 = vsub.f32 %v3514_v3, %v948_v9  ;;  %v904_v9 = vlaneseq }
 0x137   : > { %v942_v14 = vpop.xlane.xlu0 %941 }
 0x138   : > { %v3529_v13 = vsub.f32 %v3516_v4, %v950_v11  ;;  %v949_v15 = vmul.f32 0.0078125, %v942_v14  ;;  %v954_v16 = vmul.f32 %v3526_v12, %v3526_v12  ;;  %v3579_v10 = vshrl.u32 %v904_v9, 7 }
 0x13a   : > { %v956_v17 = vmul.f32 %v3529_v13, %v3529_v13  ;;  %v3536_v18 = vsub.f32 %v3518_v5, %v949_v15  ;;  %957 = vadd.xlane.f32.xlu1 %v954_v16  ;;  %v1007_v11 = vsub.s32 2, %v3579_v10  ;;  %v1003_v27 = vsub.s32 1, %v3579_v10 }
 0x13c   : > { %v961_v19 = vsel %vm3860_vm0, %v956_v17, 0.0  ;;  %v955_v20 = vmul.f32 %v3536_v18, %v3536_v18  ;;  %v3212_v17 = vmov 65535  }
 0x13e   : > { %962 = vadd.xlane.f32.xlu1 %v961_v19  ;;  %959 = vadd.xlane.f32.xlu0 %v955_v20 }
 0x1c3   : > { %v958_v45 = vpop.xlane.xlu1 %957 }
 0x1c4   : > { %v964_v46 = vmul.f32 0.0078125, %v958_v45 }
 0x1c6   : > { %v967_v47 = vadd.f32 1e-05, %v964_v46 }
 0x1c7   : > { %v963_v48 = vpop.xlane.xlu1 %962  ;;  %v960_v49 = vpop.xlane.xlu0 %959 }
 0x1c8   : > { %2954 = vrsqrt.f32 %v967_v47  ;;  %v966_v50 = vmul.f32 0.0078125, %v963_v48  ;;  %v965_v51 = vmul.f32 0.0078125, %v960_v49 }
 0x1ca   : > { %v969_v52 = vadd.f32 1e-05, %v966_v50  ;;  %v968_v53 = vadd.f32 1e-05, %v965_v51 }
 0x1cc   : > { %2956 = vrsqrt.f32 %v969_v52 }
 0x1cd   : > { %2958 = vrsqrt.f32 %v968_v53 }
 0x1d5   : > { %v2955_v54 = vpop.eup %2954 }
 0x1d6   : > { %v973_v55 = vmul.f32 %v2955_v54, %v3526_v12  ;;  %v834_v12 = vld [vmem:[%s3492_s0] sm:$0x7]  ;;  %s2497_s0 = sshll.u32 %s3186_s30, 7  ;;  %s3214_s30 = smov 64  }
 0x1d7   : > { %v1008_v14 = vrot.slane %v834_v12, %v1007_v11  ;;  %v1004_v39 = vrot.slane %v834_v12, %v1003_v27  ;;  %s912_s5 = sadd.s32 1, %s2497_s0  ;;  %s911_s25 = sld [smem:[#allocation4 + %s2497_s0]] }
 0x1d8   : > { %v982_v61 = vmul.f32 %v2499_v56, %v973_v55  ;;  %s913_s8 = sld [smem:[#allocation4 + %s912_s5]]  ;;  %v909_v55 = vand.u32 127, %v904_v9 }
 0x1d9   : > { %v2957_v57 = vpop.eup %2956 }
 0x1da   : > { %v2959_v58 = vpop.eup %2958  ;;  %v975_v59 = vmul.f32 %v2957_v57, %v3529_v13  ;;  %v991_v2 = vadd.f32 %v2500_v62, %v982_v61  ;;  %v999_v13 = vsub.s32 0, %v3579_v10  ;;  %v2498_v57 = vadd.s32 4294967283, %v909_v55 }
 0x1db   : > { %v974_v60 = vmul.f32 %v2959_v58, %v3536_v18  ;;  %v1354_v18 = vsel %vm1352_vm1, 4294967295, %v3212_v17  ;;  %vm914_vm4 = vcmp.lt.s32.totalorder %v909_v55, 13  ;;  %vm918_vm6 = vcmp.ge.s32.totalorder %v909_v55, 13 }
 0x1dc   : > { %v984_v63 = vmul.f32 %v2499_v56, %v975_v59  ;;  %v1000_v15 = vrot.slane %v834_v12, %v999_v13  ;;  %v3586_v23 = vsel %vm1353_vm2, %v1354_v18, 0  ;;  %v907_v59 = vadd.s32 16, %v3579_v10 }
 0x1dd   : > { %v983_v0 = vmul.f32 %v2499_v56, %v974_v60  ;;  %v915_v56 = vstv %s911_s25  ;;  %vm924_vm8 = vcmp.gt.s32.totalorder %v909_v55, %v3579_v10  ;;  %v906_v60 = vadd.s32 8, %v3579_v10 }
 0x1de   : > { %v993_v1 = vadd.f32 %v2500_v62, %v984_v63  ;;  %v920_v58 = vstv %s913_s8  ;;  %vm916_vm5 = vcmp.ge.s32.totalorder %v909_v55, %v915_v56  ;;  %vm926_vm10 = vcmp.gt.s32.totalorder %v909_v55, %v907_v59  ;;  %vm927_vm12 = vmand %vm918_vm6, %vm924_vm8  ;;  %v2909_v56 = vld [vmem:[%s3449_s11] sm:$0xff]  }
 0x1df   : > { %v992_v6 = vadd.f32 %v2500_v62, %v983_v0  ;;  %vm921_vm7 = vcmp.ge.s32.totalorder %v2498_v57, %v920_v58  ;;  %vm917_vm9 = vmand %vm914_vm4, %vm916_vm5  ;;  %vm925_vm14 = vcmp.gt.s32.totalorder %v909_v55, %v906_v60  ;;  %v3213_v62 = vmov 0.0   ;;  %v2908_v55 = vld [vmem:[%s3449_s11 + $0x8] sm:$0xff]  }
 0x1e0   : > { %v995_v7 = vpack.c.bf16 %v993_v1, %v993_v1  ;;  %vm922_vm11 = vmand %vm918_vm6, %vm921_vm7  ;;  %vm1309_vm4 = vcmask 171008   ;;  %vm1316_vm5 = vcmask 167936  }
 0x1e1   : > { %v994_v8 = vpack.c.bf16 %v992_v6, %v991_v2  ;;  %vm929_vm13 = vmand %vm918_vm6, %vm926_vm10 }
 0x1e2   : > { %vm923_vm15 = vmor %vm917_vm9, %vm922_vm11 }
 0x1e3   : > { %1173 = vmatmul.mubr.bf16.vlgmr.msra.gmra.mxu0 %v994_v8  ;;  %2688 = vmatprep.mubr.bf16.mxu1 %v994_v8  ;;  %vm930_vm1 = vmor %vm923_vm15, %vm927_vm12 }
 0x1e4   : > { %2689 = vmatmul.mubr.bf16.vlgmr.msra.gmra.mxu1 %v995_v7  ;;  %1182 = vmatprep.mubr.bf16.mxu0 %v3211_v37  ;;  %vm928_vm2 = vmand %vm918_vm6, %vm925_vm14  ;;  %v3623_v63 = vsel %vm930_vm1, -1e+30, %v3213_v62  ;;  %vm3921_vm14 = vcmask 1044480  }
 0x1e5   : > { %vm932_vm0 = vmor %vm923_vm15, %vm929_vm13 }
 0x1e6   : > { %v3625_v0 = vsel %vm932_vm0, -1e+30, %v3213_v62  ;;  %vm3908_vm0 = vcmask 523264  }
 0x1e7   : > { %vm3910_vm6 = vmmov %vm3908_vm0 }
 0x1e8   : > { %vm3911_vm7 = vmmov %vm3908_vm0 }
 0x1e9   : > { %vm3912_vm8 = vmmov %vm3908_vm0 }
 0x1ea   : > { %vm3913_vm9 = vmmov %vm3908_vm0 }
 0x1eb   : > { %1183 = vmatmul.mubr.bf16.gmra.mxu0 %v995_v7  ;;  %vm3914_vm10 = vmmov %vm3908_vm0 }
 0x1ec   : > { %vm3915_vm11 = vmmov %vm3908_vm0 }
 0x1ed   : > { %vm3916_vm12 = vmmov %vm3908_vm0 }
 0x1ee   : > { %vm3917_vm13 = vmmov %vm3908_vm0 }
 0x2a3   : > { %v1174_v16 = vpop.f32.mrf.mxu0 }
 0x2a4   : > { %v2690_v19 = vpop.f32.mrf.mxu1  ;;  %v1175_v22 = vadd.f32 %v1174_v16, %v1000_v15 }
 0x2a5   : > { %v1234_v20 = vadd.f32 %v2690_v19, %v1008_v14  ;;  %v1176_v21 = vpop.f32.mrf.mxu0 }
 0x2a6   : > { %v1225_v24 = vpop.f32.mrf.mxu1  ;;  %v1239_v32 = vmul.f32 0.125, %v1175_v22  ;;  %v1177_v46 = vadd.f32 %v1176_v21, %v1004_v39 }
 0x2a7   : > { %v3588_v25 = vpack.c.bf16 %v1234_v20, %v1234_v20  ;;  %v1178_v26 = vpop.f32.mrf.mxu0  ;;  %v1226_v35 = vadd.f32 %v1225_v24, %v1008_v14 }
 0x2a8   : > { %v1179_v28 = vadd.f32 %v1178_v26, %v1000_v15  ;;  %v2691_v29 = vpop.f32.mrf.mxu1 }
 0x2a9   : > { %v1357_v30 = vand.u32 %v3586_v23, %v3588_v25  ;;  %v1180_v31 = vpop.f32.mrf.mxu0 }
 0x2aa   : > { %v1240_v33 = vmul.f32 0.125, %v1179_v28  ;;  %v1228_v34 = vpop.f32.mrf.mxu1  ;;  %v1181_v43 = vadd.f32 %v1180_v31, %v1004_v39 }
 0x2ab   : > { %v1229_v36 = vadd.f32 %v1228_v34, %v1008_v14  ;;  %v1184_v38 = vpop.f32.mrf.mxu0  ;;  %2700 = vmatprep.subr.bf16.mxu1 %v1357_v30 }
 0x2ac   : > { %v3595_v40 = vpack.c.bf16 %v1240_v33, %v1239_v32  ;;  %2701 = vmatpush3.bf16.msra.mxu1 %v1357_v30  ;;  %v3605_v49 = vpack.c.bf16 %v1181_v43, %v1177_v46  ;;  %v1185_v51 = vadd.f32 %v1184_v38, %v1000_v15 }
 0x2ad   : > { %v3597_v41 = vpack.c.bf16 %v1229_v36, %v1226_v35  ;;  %v1186_v42 = vpop.f32.mrf.mxu0 }
 0x2ae   : > { %v1187_v44 = vadd.f32 %v1186_v42, %v1004_v39  ;;  %2696 = vmatprep.mubr.msk.bf16.mxu0 %vm3861_vm3, %v3595_v40  ;;  %v1256_v52 = vsel %vm3861_vm3, %v3605_v49, 0  ;;  %v1241_v53 = vmul.f32 0.125, %v1185_v51  ;;  %v2906_v51 = vld [vmem:[%s3449_s11 + $0x18] sm:$0xff]  }
 0x2af   : > { %v1188_v45 = vpop.f32.mrf.mxu0  ;;  %2702 = vmatprep.subr.bf16.mxu1 %v3597_v41 }
 0x2b0   : > { %v3602_v47 = vpack.c.bf16 %v1187_v44, %v1187_v44  ;;  %2703 = vmatpush3.bf16.msra.mxu1 %v3597_v41  ;;  %v3615_v54 = vpack.c.bf16 %v1241_v53, %v1241_v53  ;;  %v2907_v53 = vld [vmem:[%s3449_s11 + $0x10] sm:$0xff]  }
 0x2b1   : > { %v1189_v48 = vpop.f32.mrf.mxu0 }
 0x2b2   : > { %2768 = vmatprep.subr.msk.bf16.mxu0 %vm3861_vm3, %v3602_v47  ;;  %v1259_v50 = vsel %vm3861_vm3, %v3602_v47, 0 }
 0x2b3   : > { %2693 = vmatpush3.bf16.xpose.msra.mxu0 %v1259_v50 }
 0x2b4   : > { %2769 = vmatprep.subr.msk.bf16.mxu0 %vm3861_vm3, %v3605_v49 }
 0x2bb   : > { %2695 = vmatpush3.bf16.xpose.msra.mxu0 %v1256_v52 }
 0x2c2   : > { %2697 = vmatmul.mubr.msk.bf16.vlgmr.msra.gmra.mxu0 %vm3861_vm3, %v3615_v54  ;;  %vm931_vm3 = vmor %vm923_vm15, %vm928_vm2 }
 0x2c3   : > { %v3628_v7 = vsel %vm931_vm3, -1e+30, %v3213_v62  ;;  %vm3909_vm3 = vmmov %vm3908_vm0 }
 0x2c4   : > { %vm3922_vm15 = vmmov %vm3921_vm14 }
 0x382   : > { %v2698_v61 = vpop.f32.mrf.mxu0 }
 0x383   : > { %v1304_v8 = vadd.f32 %v2698_v61, %v3625_v0 }
 0x384   : > { %v1295_v1 = vpop.f32.mrf.mxu0 }
 0x385   : > { %v1296_v2 = vadd.f32 %v1295_v1, %v3623_v63  ;;  %v1317_v15 = vsel %vm1316_vm5, %v1304_v8, -inf }
 0x386   : > { %v2699_v6 = vpop.f32.mrf.mxu0 }
 0x387   : > { %v1310_v9 = vsel %vm1309_vm4, %v1296_v2, -inf }
 0x388   : > { %v1298_v11 = vpop.f32.mrf.mxu0  ;;  %1311 = vmax.xlane.f32.xlu0 %v1310_v9 }
 0x389   : > { %v1299_v12 = vadd.f32 %v1298_v11, %v3628_v7 }
 0x38b   : > { %v1313_v14 = vsel %vm1309_vm4, %v1299_v12, -inf }
 0x38c   : > { %1314 = vmax.xlane.f32.xlu1 %v1313_v14  ;;  %1318 = vmax.xlane.f32.xlu0 %v1317_v15 }
 0x411   : > { %v1312_v16 = vpop.xlane.xlu0 %1311 }
 0x412   : > { %v1320_v17 = vsub.f32 %v1296_v2, %v1312_v16 }
 0x414   : > { %v1323_v18 = vmul.f32 1.442695, %v1320_v17 }
 0x415   : > { %v1315_v19 = vpop.xlane.xlu1 %1314  ;;  %v1319_v20 = vpop.xlane.xlu0 %1318 }
 0x416   : > { %2960 = vpow2.f32 %v1323_v18  ;;  %v1321_v21 = vsub.f32 %v1299_v12, %v1315_v19  ;;  %v1322_v22 = vsub.f32 %v1304_v8, %v1319_v20 }
 0x418   : > { %v1325_v24 = vmul.f32 1.442695, %v1321_v21  ;;  %v1327_v26 = vmul.f32 1.442695, %v1322_v22 }
 0x41a   : > { %2962 = vpow2.f32 %v1325_v24 }
 0x41b   : > { %2964 = vpow2.f32 %v1327_v26 }
 0x423   : > { %v2961_v28 = vpop.eup %2960 }
 0x424   : > { %v1329_v29 = vsel %vm1309_vm4, %v2961_v28, 0.0 }
 0x425   : > { %1330 = vadd.xlane.f32.xlu1 %v1329_v29 }
 0x427   : > { %v2963_v30 = vpop.eup %2962 }
 0x428   : > { %v2965_v31 = vpop.eup %2964  ;;  %v1332_v32 = vsel %vm1309_vm4, %v2963_v30, 0.0 }
 0x429   : > { %1333 = vadd.xlane.f32.xlu0 %v1332_v32  ;;  %v1335_v33 = vsel %vm1316_vm5, %v2965_v31, 0.0 }
 0x42a   : > { %1336 = vadd.xlane.f32.xlu1 %v1335_v33 }
 0x43b   : > { %1417 = vrot.lane.b32.xlu1 %v3605_v49, %s3214_s30 }
 0x43f   : > { %1411 = vrot.lane.b32.xlu1 %v3595_v40, %s3214_s30  ;;  %1419 = vrot.lane.b32.xlu0 %v3602_v47, %s3214_s30 }
 0x443   : > { %1413 = vrot.lane.b32.xlu1 %v3615_v54, %s3214_s30 }
 0x4ae   : > { %v1331_v34 = vpop.xlane.xlu1 %1330 }
 0x4af   : > { %2966 = vrcp.f32 %v1331_v34 }
 0x4b2   : > { %v1334_v35 = vpop.xlane.xlu0 %1333 }
 0x4b3   : > { %v1337_v36 = vpop.xlane.xlu1 %1336  ;;  %2968 = vrcp.f32 %v1334_v35 }
 0x4b4   : > { %2970 = vrcp.f32 %v1337_v36 }
 0x4b6   : > { %v1420_v38 = vpop.permute.xlu0 %1419 }
 0x4b7   : > { %2770 = vmatprep.subr.msk.bf16.mxu1 %vm3908_vm0, %v1420_v38  ;;  %v1418_v43 = vpop.permute.xlu1 %1417  ;;  %v1431_v49 = vsel %vm3909_vm3, %v1420_v38, 0 }
 0x4b8   : > { %v1428_v52 = vsel %vm3912_vm8, %v1418_v43, 0 }
 0x4bb   : > { %v1412_v50 = vpop.permute.xlu1 %1411 }
 0x4bc   : > { %v2967_v39 = vpop.eup %2966 }
 0x4bd   : > { %v1341_v44 = vmul.f32 %v2967_v39, %v2961_v28 }
 0x4bf   : > { %v1414_v54 = vpop.permute.xlu1 %1413 }
 0x4c0   : > { %v2969_v42 = vpop.eup %2968 }
 0x4c1   : > { %v2971_v40 = vpop.eup %2970  ;;  %v1342_v45 = vmul.f32 %v2969_v42, %v2963_v30 }
 0x4c2   : > { %v1343_v46 = vmul.f32 %v2971_v40, %v2965_v31 }
 0x4c3   : > { %v1344_v47 = vpack.c.bf16 %v1342_v45, %v1341_v44 }
 0x4c4   : > { %v1345_v48 = vpack.c.bf16 %v1343_v46, %v1343_v46 }
 0x4c5   : > { %2704 = vmatprep.mubr.msk.bf16.mxu1 %vm1309_vm4, %v1344_v47 }
 0x4c6   : > { %2705 = vmatmul.mubr.msk.bf16.vlgmr.msra.gmra.mxu1 %vm1309_vm4, %v1345_v48 }
 0x4c7   : > { %2709 = vmatpush3.bf16.xpose.msra.mxu1 %v1431_v49  ;;  %2712 = vmatprep.mubr.msk.bf16.mxu1 %vm3910_vm6, %v1412_v50  ;;  %v2911_v50 = vld [vmem:[%s3449_s11 + $0x30] sm:$0xff]  }
 0x4c8   : > { %2771 = vmatprep.subr.msk.bf16.mxu1 %vm3911_vm7, %v1418_v43 }
 0x4cf   : > { %2711 = vmatpush3.bf16.xpose.msra.mxu1 %v1428_v52 }
 0x4d0   : > { %2736 = vmatprep.subr.bf16.mxu1 %v2906_v51 }
 0x4d6   : > { %2713 = vmatmul.mubr.msk.bf16.vlgmr.msra.gmra.mxu1 %vm3913_vm9, %v1414_v54 }
 0x4d7   : > { %2737 = vmatpush3.bf16.msra.mxu1 %v2906_v51  ;;  %v2913_v51 = vld [vmem:[%s3449_s11 + $0x20] sm:$0xff]  }
 0x4d8   : > { %2738 = vmatprep.subr.bf16.mxu1 %v2907_v53 }
 0x4db   : > { %2739 = vmatpush3.bf16.msra.mxu1 %v2907_v53 }
 0x4dc   : > { %2740 = vmatprep.subr.bf16.mxu1 %v2908_v55 }
 0x4df   : > { %2741 = vmatpush3.bf16.msra.mxu1 %v2908_v55 }
 0x4e0   : > { %2742 = vmatprep.subr.bf16.mxu1 %v2909_v56 }
 0x4e3   : > { %2743 = vmatpush3.bf16.msra.mxu1 %v2909_v56 }
 0x586   : > { %v2706_v57 = vpop.f32.mrf.mxu1 }
 0x587   : > { %v1408_v62 = vpack.c.bf16 %v2706_v57, %v2706_v57 }
 0x588   : > { %v1393_v58 = vpop.f32.mrf.mxu1 }
 0x58a   : > { %v2707_v59 = vpop.f32.mrf.mxu1 }
 0x58c   : > { %v1396_v60 = vpop.f32.mrf.mxu1 }
 0x58d   : > { %v1407_v61 = vpack.c.bf16 %v1396_v60, %v1393_v58 }
 0x58f   : > { %2744 = vmatprep.mubr.msk.bf16.mxu1 %vm3914_vm10, %v1407_v61 }
 0x590   : > { %2745 = vmatmul.mubr.msk.bf16.vlgmr.msra.gmra.mxu1 %vm3915_vm11, %v1408_v62 }
 0x596   : > { %v2714_v1 = vpop.f32.mrf.mxu1 }
 0x597   : > { %v1476_v9 = vadd.f32 %v2714_v1, %v3625_v0 }
 0x598   : > { %v1467_v2 = vpop.f32.mrf.mxu1 }
 0x599   : > { %v1468_v6 = vadd.f32 %v1467_v2, %v3623_v63  ;;  %v1487_v16 = vsel %vm1316_vm5, %v1476_v9, -inf }
 0x59a   : > { %v2715_v8 = vpop.f32.mrf.mxu1 }
 0x59b   : > { %v1481_v11 = vsel %vm1309_vm4, %v1468_v6, -inf }
 0x59c   : > { %v1470_v12 = vpop.f32.mrf.mxu1  ;;  %1482 = vmax.xlane.f32.xlu0 %v1481_v11 }
 0x59d   : > { %v1471_v14 = vadd.f32 %v1470_v12, %v3628_v7 }
 0x59f   : > { %v1484_v15 = vsel %vm1309_vm4, %v1471_v14, -inf }
 0x5a0   : > { %1485 = vmax.xlane.f32.xlu1 %v1484_v15  ;;  %1488 = vmax.xlane.f32.xlu0 %v1487_v16 }
 0x625   : > { %v1483_v17 = vpop.xlane.xlu0 %1482 }
 0x626   : > { %v1490_v18 = vsub.f32 %v1468_v6, %v1483_v17  ;;  %v2545_v6 = vld [vmem:[%s3920_s28] ss:$0 sm:$0xff] }
 0x628   : > { %v1493_v19 = vmul.f32 1.442695, %v1490_v18 }
 0x629   : > { %v1486_v20 = vpop.xlane.xlu1 %1485  ;;  %v1489_v63 = vpop.xlane.xlu0 %1488 }
 0x62a   : > { %2972 = vpow2.f32 %v1493_v19  ;;  %v1491_v21 = vsub.f32 %v1471_v14, %v1486_v20  ;;  %v1492_v0 = vsub.f32 %v1476_v9, %v1489_v63 }
 0x62c   : > { %v1495_v22 = vmul.f32 1.442695, %v1491_v21  ;;  %v1497_v24 = vmul.f32 1.442695, %v1492_v0 }
 0x62e   : > { %2974 = vpow2.f32 %v1495_v22 }
 0x62f   : > { %2976 = vpow2.f32 %v1497_v24 }
 0x637   : > { %v2973_v26 = vpop.eup %2972 }
 0x638   : > { %v1499_v7 = vsel %vm1309_vm4, %v2973_v26, 0.0 }
 0x639   : > { %1500 = vadd.xlane.f32.xlu0 %v1499_v7 }
 0x63b   : > { %v2975_v28 = vpop.eup %2974 }
 0x63c   : > { %v2977_v29 = vpop.eup %2976  ;;  %v1502_v30 = vsel %vm1309_vm4, %v2975_v28, 0.0 }
 0x63d   : > { %1503 = vadd.xlane.f32.xlu0 %v1502_v30  ;;  %v1505_v31 = vsel %vm1316_vm5, %v2977_v29, 0.0 }
 0x63e   : > { %1506 = vadd.xlane.f32.xlu1 %v1505_v31 }
 0x64f   : > { %1518 = vrot.lane.b32.xlu1 %v3597_v41, %s3214_s30  ;;  %v2910_v41 = vld [vmem:[%s3449_s11 + $0x38] sm:$0xff]  }
 0x650   : > { %v2746_v32 = vpop.f32.mrf.mxu1 }
 0x652   : > { %v1724_v33 = vpop.f32.mrf.mxu1 }
 0x653   : > { %1520 = vrot.lane.b32.xlu0 %v3588_v25, %s3214_s30 }
 0x654   : > { %v2747_v34 = vpop.f32.mrf.mxu1 }
 0x656   : > { %v1727_v2 = vpop.f32.mrf.mxu1 }
 0x6c2   : > { %v1501_v35 = vpop.xlane.xlu0 %1500 }
 0x6c3   : > { %2978 = vrcp.f32 %v1501_v35 }
 0x6c6   : > { %v1504_v36 = vpop.xlane.xlu0 %1503 }
 0x6c7   : > { %v1507_v38 = vpop.xlane.xlu1 %1506  ;;  %2980 = vrcp.f32 %v1504_v36 }
 0x6c8   : > { %2982 = vrcp.f32 %v1507_v38 }
 0x6ca   : > { %v1521_v39 = vpop.permute.xlu0 %1520 }
 0x6cb   : > { %v1530_v42 = vand.u32 %v1521_v39, %v3586_v23  ;;  %v1519_v43 = vpop.permute.xlu1 %1518  ;;  %v2912_v23 = vld [vmem:[%s3449_s11 + $0x28] sm:$0xff]   ;;  %s3918_s11 = sld [smem:[#allocation24_spill]] }
 0x6cd   : > { %2716 = vmatprep.subr.bf16.mxu0 %v1530_v42 }
 0x6ce   : > { %2717 = vmatpush3.bf16.msra.mxu0 %v1530_v42 }
 0x6cf   : > { %2718 = vmatprep.subr.bf16.mxu0 %v1519_v43 }
 0x6d0   : > { %v2979_v40 = vpop.eup %2978 }
 0x6d1   : > { %v1511_v45 = vmul.f32 %v2979_v40, %v2973_v26  ;;  %v2914_v17 = vld [vmem:[%s3918_s11 + $0x70] ss:$8 sps:$4 sm:$0xff]   ;;  %v2916_v18 = vld [vmem:[%s3918_s11 + $0x74] ss:$8 sps:$4 sm:$0xff]   ;;  %v2919_v30 = vld [vmem:[%s3918_s11 + $0x64] ss:$8 sps:$4 sm:$0xff]  }
 0x6d2   : > { %2719 = vmatpush3.bf16.msra.mxu0 %v1519_v43  ;;  %v2917_v31 = vld [vmem:[%s3918_s11 + $0x60] ss:$8 sps:$4 sm:$0xff]   ;;  %v2925_v34 = vld [vmem:[%s3918_s11 + $0x44] ss:$8 sps:$4 sm:$0xff]   ;;  %v2926_v36 = vld [vmem:[%s3918_s11 + $0x30] ss:$8 sps:$4 sm:$0xff]  }
 0x6d3   : > { %2724 = vmatprep.subr.bf16.mxu0 %v2910_v41  ;;  %v2923_v35 = vld [vmem:[%s3918_s11 + $0x40] ss:$8 sps:$4 sm:$0xff]   ;;  %v2928_v38 = vld [vmem:[%s3918_s11 + $0x34] ss:$8 sps:$4 sm:$0xff]   ;;  %v2931_v39 = vld [vmem:[%s3918_s11 + $0x24] ss:$8 sps:$4 sm:$0xff]  }
 0x6d4   : > { %v2981_v25 = vpop.eup %2980  ;;  %v2929_v42 = vld [vmem:[%s3918_s11 + $0x20] ss:$8 sps:$4 sm:$0xff]   ;;  %v2934_v43 = vld [vmem:[%s3918_s11 + $0x14] ss:$8 sps:$4 sm:$0xff]   ;;  %v2937_v40 = vld [vmem:[%s3918_s11 + $0x4] ss:$8 sps:$4 sm:$0xff]  }
 0x6d5   : > { %v2983_v44 = vpop.eup %2982  ;;  %v1512_v46 = vmul.f32 %v2981_v25, %v2975_v28  ;;  %v2935_v25 = vld [vmem:[%s3918_s11] ss:$8 sps:$4 sm:$0xff]  }
 0x6d6   : > { %v1513_v47 = vmul.f32 %v2983_v44, %v2977_v29  ;;  %v2938_v44 = vld [vmem:[%s3923_s19 + $0x78] sm:$0xff]  }
 0x6d7   : > { %v1514_v48 = vpack.c.bf16 %v1512_v46, %v1511_v45  ;;  %v2939_v45 = vld [vmem:[%s3923_s19 + $0x38] sm:$0xff]   ;;  %v2940_v46 = vld [vmem:[%s3923_s19 + $0x70] sm:$0xff]   ;;  %2634 = vmatprep.subr.bf16.mxu1 %v2938_v44 }
 0x6d8   : > { %v1515_v49 = vpack.c.bf16 %v1513_v47, %v1513_v47  ;;  %2635 = vmatpush3.bf16.msra.mxu1 %v2939_v45  ;;  %v2941_v47 = vld [vmem:[%s3923_s19 + $0x30] sm:$0xff]  }
 0x6d9   : > { %2720 = vmatprep.mubr.msk.bf16.mxu0 %vm1309_vm4, %v1514_v48  ;;  %2636 = vmatprep.subr.bf16.mxu1 %v2940_v46  ;;  %v2942_v48 = vld [vmem:[%s3923_s19 + $0x68] sm:$0xff]  }
 0x6da   : > { %2721 = vmatmul.mubr.msk.bf16.vlgmr.msra.gmra.mxu0 %vm1309_vm4, %v1515_v49  ;;  %v2943_v49 = vld [vmem:[%s3923_s19 + $0x28] sm:$0xff]  }
 0x6db   : > { %2725 = vmatpush3.bf16.msra.mxu0 %v2910_v41  ;;  %v2932_v41 = vld [vmem:[%s3918_s11 + $0x10] ss:$8 sps:$4 sm:$0xff]  }
 0x6dc   : > { %2726 = vmatprep.subr.bf16.mxu0 %v2911_v50  ;;  %2637 = vmatpush3.bf16.msra.mxu1 %v2941_v47 }
 0x6dd   : > { %2638 = vmatprep.subr.bf16.mxu1 %v2942_v48 }
 0x6df   : > { %2727 = vmatpush3.bf16.msra.mxu0 %v2911_v50  ;;  %v2944_v50 = vld [vmem:[%s3923_s19 + $0x60] sm:$0xff]  }
 0x6e0   : > { %2728 = vmatprep.subr.bf16.mxu0 %v2912_v23  ;;  %2639 = vmatpush3.bf16.msra.mxu1 %v2943_v49 }
 0x6e1   : > { %2640 = vmatprep.subr.bf16.mxu1 %v2944_v50 }
 0x6e3   : > { %2729 = vmatpush3.bf16.msra.mxu0 %v2912_v23  ;;  %v2945_v23 = vld [vmem:[%s3923_s19 + $0x20] sm:$0xff]  }
 0x6e4   : > { %2730 = vmatprep.subr.bf16.mxu0 %v2913_v51  ;;  %2641 = vmatpush3.bf16.msra.mxu1 %v2945_v23 }
 0x6e7   : > { %2731 = vmatpush3.bf16.msra.mxu0 %v2913_v51  ;;  %v2946_v51 = vld [vmem:[%s3923_s19 + $0x58] sm:$0xff]  }
 0x6e8   : > { %1896 = vmatprep.subr.bf16.mxu0 %v2916_v18  ;;  %2642 = vmatprep.subr.bf16.mxu1 %v2946_v51  ;;  %v2564_v51 = vld [vmem:[%s783_s13] ss:$0 sm:$0xff] }
 0x79a   : > { %v2722_v52 = vpop.f32.mrf.mxu0 }
 0x79b   : > { %v1581_v57 = vpack.c.bf16 %v2722_v52, %v2722_v52  ;;  %v2947_v52 = vld [vmem:[%s3923_s19 + $0x18] sm:$0xff]  }
 0x79c   : > { %v1566_v53 = vpop.f32.mrf.mxu0  ;;  %2643 = vmatpush3.bf16.msra.mxu1 %v2947_v52 }
 0x79e   : > { %v2723_v54 = vpop.f32.mrf.mxu0 }
 0x7a0   : > { %v1569_v55 = vpop.f32.mrf.mxu0 }
 0x7a1   : > { %v1580_v56 = vpack.c.bf16 %v1569_v55, %v1566_v53 }
 0x7a3   : > { %2732 = vmatprep.mubr.msk.bf16.mxu0 %vm3916_vm12, %v1580_v56 }
 0x7a4   : > { %2733 = vmatmul.mubr.msk.bf16.vlgmr.msra.gmra.mxu0 %vm3917_vm13, %v1581_v57 }
 0x7a5   : > { %1928 = vmatprep.mubr.bf16.mxu0 %v3211_v37  ;;  %1897 = vmatpush1.bf16.msra.mxu0 %v2914_v17 }
 0x7a6   : > { %1898 = vmatprep.subr.bf16.mxu0 %v2919_v30 }
 0x7a9   : > { %1899 = vmatpush1.bf16.msra.mxu0 %v2917_v31 }
 0x864   : > { %v2734_v58 = vpop.f32.mrf.mxu0 }
 0x865   : > { %v1733_v61 = vadd.f32 %v2746_v32, %v2734_v58  ;;  %v2922_v32 = vld [vmem:[%s3918_s11 + $0x54] ss:$8 sps:$4 sm:$0xff]  }
 0x866   : > { %v1646_v59 = vpop.f32.mrf.mxu0  ;;  %1900 = vmatprep.subr.bf16.mxu0 %v2922_v32 }
 0x867   : > { %v1725_v60 = vadd.f32 %v1724_v33, %v1646_v59  ;;  %v1740_v12 = vadd.f32 %v1733_v61, %v3516_v4  ;;  %v2920_v33 = vld [vmem:[%s3918_s11 + $0x50] ss:$8 sps:$4 sm:$0xff]  }
 0x868   : > { %v2735_v62 = vpop.f32.mrf.mxu0  ;;  %1901 = vmatpush1.bf16.msra.mxu0 %v2920_v33 }
 0x869   : > { %v1738_v1 = vadd.f32 %v1725_v60, %v3514_v3  ;;  %v3696_v16 = vadd.f32 %v2545_v6, %v1740_v12  ;;  %1902 = vmatprep.subr.bf16.mxu0 %v2925_v34  ;;  %v2547_v12 = vld [vmem:[%s776_s17] ss:$0 sm:$0xff] }
 0x86a   : > { %v1649_v8 = vpop.f32.mrf.mxu0 }
 0x86b   : > { %v1728_v9 = vadd.f32 %v1727_v2, %v1649_v8  ;;  %v3689_v11 = vadd.f32 %v2545_v6, %v1738_v1  ;;  %v1754_v3 = vsel %vm3921_vm14, %v3696_v16, 0.0  ;;  %v2546_v2 = vld [vmem:[%s773_s9] ss:$0 sm:$0xff] }
 0x86c   : > { %1903 = vmatpush1.bf16.msra.mxu0 %v2923_v35 }
 0x86d   : > { %v1739_v14 = vadd.f32 %v1728_v9, %v3518_v5  ;;  %1750 = vadd.xlane.f32.xlu1 %v3689_v11  ;;  %1904 = vmatprep.subr.bf16.mxu0 %v2928_v38 }
 0x86f   : > { %v3694_v15 = vadd.f32 %v2545_v6, %v1739_v14 }
 0x870   : > { %1905 = vmatpush1.bf16.msra.mxu0 %v2926_v36 }
 0x871   : > { %1752 = vadd.xlane.f32.xlu0 %v3694_v15  ;;  %1906 = vmatprep.subr.bf16.mxu0 %v2931_v39 }
 0x874   : > { %1907 = vmatpush1.bf16.msra.mxu0 %v2929_v42 }
 0x875   : > { %1755 = vadd.xlane.f32.xlu0 %v1754_v3  ;;  %1908 = vmatprep.subr.bf16.mxu0 %v2934_v43 }
 0x878   : > { %1909 = vmatpush1.bf16.msra.mxu0 %v2932_v41 }
 0x879   : > { %1910 = vmatprep.subr.bf16.mxu0 %v2937_v40 }
 0x87c   : > { %1911 = vmatpush1.bf16.msra.mxu0 %v2935_v25 }
 0x8f6   : > { %v1751_v19 = vpop.xlane.xlu1 %1750 }
 0x8f7   : > { %v1757_v4 = vmul.f32 0.0078125, %v1751_v19 }
 0x8f9   : > { %v3704_v5 = vsub.f32 %v3689_v11, %v1757_v4 }
 0x8fa   : > { %v1753_v20 = vpop.xlane.xlu0 %1752 }
 0x8fb   : > { %v1758_v63 = vmul.f32 0.0078125, %v1753_v20  ;;  %v1763_v21 = vmul.f32 %v3704_v5, %v3704_v5 }
 0x8fd   : > { %v3709_v0 = vsub.f32 %v3694_v15, %v1758_v63  ;;  %1766 = vadd.xlane.f32.xlu1 %v1763_v21  ;;  %v2948_v21 = vld [vmem:[%s3923_s19 + $0x50] sm:$0xff]  }
 0x8fe   : > { %v1756_v22 = vpop.xlane.xlu0 %1755  ;;  %2644 = vmatprep.subr.bf16.mxu1 %v2948_v21 }
 0x8ff   : > { %v1759_v24 = vmul.f32 0.0078125, %v1756_v22  ;;  %v1764_v26 = vmul.f32 %v3709_v0, %v3709_v0  ;;  %v2950_v22 = vld [vmem:[%s3923_s19 + $0x48] sm:$0xff]  }
 0x901   : > { %v3714_v7 = vsub.f32 %v3696_v16, %v1759_v24  ;;  %1768 = vadd.xlane.f32.xlu0 %v1764_v26  ;;  %v2951_v24 = vld [vmem:[%s3923_s19 + $0x8] sm:$0xff]   ;;  %v2952_v26 = vld [vmem:[%s3923_s19 + $0x40] sm:$0xff]  }
 0x903   : > { %v1765_v28 = vmul.f32 %v3714_v7, %v3714_v7 }
 0x905   : > { %v1770_v29 = vsel %vm3922_vm15, %v1765_v28, 0.0  ;;  %v870_v28 = vld [vmem:[%s3506_s14] sm:$0x3] }
 0x906   : > { %1771 = vadd.xlane.f32.xlu1 %v1770_v29  ;;  %v1809_v30 = vrot.slane %v870_v28, %v999_v13 }
 0x986   : > { %v1767_v53 = vpop.xlane.xlu1 %1766 }
 0x987   : > { %v1773_v54 = vmul.f32 0.0078125, %v1767_v53 }
 0x989   : > { %v1776_v55 = vadd.f32 1e-05, %v1773_v54 }
 0x98a   : > { %v1769_v56 = vpop.xlane.xlu0 %1768 }
 0x98b   : > { %2984 = vrsqrt.f32 %v1776_v55  ;;  %v1774_v57 = vmul.f32 0.0078125, %v1769_v56 }
 0x98d   : > { %v1777_v58 = vadd.f32 1e-05, %v1774_v57 }
 0x98f   : > { %2986 = vrsqrt.f32 %v1777_v58  ;;  %v1772_v59 = vpop.xlane.xlu1 %1771 }
 0x990   : > { %v1775_v60 = vmul.f32 0.0078125, %v1772_v59 }
 0x992   : > { %v1778_v61 = vadd.f32 1e-05, %v1775_v60 }
 0x994   : > { %2988 = vrsqrt.f32 %v1778_v61 }
 0x998   : > { %v2985_v62 = vpop.eup %2984 }
 0x999   : > { %v1782_v1 = vmul.f32 %v2985_v62, %v3704_v5 }
 0x99b   : > { %v1791_v9 = vmul.f32 %v2546_v2, %v1782_v1 }
 0x99c   : > { %v2987_v6 = vpop.eup %2986 }
 0x99d   : > { %v1783_v8 = vmul.f32 %v2987_v6, %v3709_v0  ;;  %v1800_v17 = vadd.f32 %v2547_v12, %v1791_v9  ;;  %v2949_v0 = vld [vmem:[%s3923_s19 + $0x10] sm:$0xff]  }
 0x99e   : > { %2645 = vmatpush3.bf16.msra.mxu1 %v2949_v0 }
 0x99f   : > { %v1792_v14 = vmul.f32 %v2546_v2, %v1783_v8  ;;  %2646 = vmatprep.subr.bf16.mxu1 %v2950_v22 }
 0x9a1   : > { %v2989_v3 = vpop.eup %2988  ;;  %v1801_v18 = vadd.f32 %v2547_v12, %v1792_v14 }
 0x9a2   : > { %v1784_v19 = vmul.f32 %v2989_v3, %v3714_v7  ;;  %2647 = vmatpush3.bf16.msra.mxu1 %v2951_v24  ;;  %v2953_v7 = vld [vmem:[%s3923_s19] sm:$0xff]  }
 0x9a3   : > { %v1803_v4 = vpack.c.bf16 %v1801_v18, %v1800_v17  ;;  %2648 = vmatprep.subr.bf16.mxu1 %v2952_v26 }
 0x9a4   : > { %v1793_v5 = vmul.f32 %v2546_v2, %v1784_v19 }
 0x9a5   : > { %1929 = vmatmul.mubr.bf16.vlgmr.msra.gmra.mxu0 %v1803_v4 }
 0x9a6   : > { %1938 = vmatprep.mubr.bf16.mxu0 %v3211_v37  ;;  %v1802_v20 = vadd.f32 %v2547_v12, %v1793_v5  ;;  %2649 = vmatpush3.bf16.msra.mxu1 %v2953_v7  ;;  %v1813_v37 = vrot.slane %v870_v28, %v1003_v27 }
 0x9a8   : > { %v1804_v63 = vpack.c.bf16 %v1802_v20, %v1802_v20 }
 0x9ad   : > { %1939 = vmatmul.mubr.bf16.gmra.mxu0 %v1804_v63 }
 0xa65   : > { %v1930_v29 = vpop.f32.mrf.mxu0 }
 0xa66   : > { %v1931_v35 = vadd.f32 %v1930_v29, %v1809_v30 }
 0xa67   : > { %v1932_v31 = vpop.f32.mrf.mxu0 }
 0xa68   : > { %v1933_v33 = vadd.f32 %v1932_v31, %v1813_v37  ;;  %v1947_v40 = vmax.f32 %v1931_v35, 0.0 }
 0xa69   : > { %v1934_v32 = vpop.f32.mrf.mxu0 }
 0xa6a   : > { %v1935_v34 = vadd.f32 %v1934_v32, %v1809_v30  ;;  %v1948_v43 = vmax.f32 %v1933_v33, 0.0 }
 0xa6b   : > { %v1936_v36 = vpop.f32.mrf.mxu0 }
 0xa6c   : > { %v1937_v38 = vadd.f32 %v1936_v36, %v1813_v37  ;;  %v1949_v39 = vmax.f32 %v1935_v34, 0.0 }
 0xa6d   : > { %v1940_v42 = vpop.f32.mrf.mxu0 }
 0xa6e   : > { %v1950_v41 = vmax.f32 %v1937_v38, 0.0  ;;  %v1953_v27 = vpack.c.bf16 %v1949_v39, %v1947_v40  ;;  %v1941_v46 = vadd.f32 %v1940_v42, %v1809_v30 }
 0xa6f   : > { %v1942_v25 = vpop.f32.mrf.mxu0 }
 0xa70   : > { %v1954_v44 = vpack.c.bf16 %v1950_v41, %v1948_v43  ;;  %v1943_v45 = vadd.f32 %v1942_v25, %v1813_v37  ;;  %v1951_v49 = vmax.f32 %v1941_v46, 0.0 }
 0xa71   : > { %v1944_v10 = vpop.f32.mrf.mxu0 }
 0xa72   : > { %v1952_v13 = vmax.f32 %v1943_v45, 0.0  ;;  %2091 = vmatprep.mubr.bf16.mxu1 %v1954_v44  ;;  %v1955_v50 = vpack.c.bf16 %v1951_v49, %v1951_v49 }
 0xa73   : > { %v1945_v47 = vpop.f32.mrf.mxu0  ;;  %2092 = vmatmul.mubr.bf16.vlgmr.msra.gmra.mxu1 %v1953_v27 }
 0xa74   : > { %v1956_v48 = vpack.c.bf16 %v1952_v13, %v1952_v13 }
 0xa76   : > { %2099 = vmatprep.mubr.bf16.mxu1 %v1956_v48 }
 0xa7b   : > { %2100 = vmatmul.mubr.bf16.gmra.mxu1 %v1955_v50 }
 0xb33   : > { %v2650_v23 = vpop.f32.mrf.mxu1 }
 0xb35   : > { %v2651_v52 = vpop.f32.mrf.mxu1 }
 0xb36   : > { %v2652_v53 = vadd.f32 %v2651_v52, %v2650_v23 }
 0xb37   : > { %v2653_v54 = vpop.f32.mrf.mxu1 }
 0xb38   : > { %v2094_v55 = vadd.f32 %v2652_v53, %v2564_v51 }
 0xb39   : > { %v2654_v56 = vpop.f32.mrf.mxu1 }
 0xb3a   : > { %v2107_v57 = vadd.f32 %v2094_v55, %v3689_v11  ;;  %v2655_v58 = vadd.f32 %v2654_v56, %v2653_v54 }
 0xb3b   : > { %v2656_v59 = vpop.f32.mrf.mxu1 }
 0xb3c   : > { %2110 = vst [vmem:[#allocation2 + $0x10] sm:$0xff] %v2107_v57  ;;  %v2097_v60 = vadd.f32 %v2655_v58, %v2564_v51 }
 0xb3d   : > { %v2657_v61 = vpop.f32.mrf.mxu1 }
 0xb3e   : > { %v2108_v62 = vadd.f32 %v2097_v60, %v3694_v15  ;;  %v2658_v1 = vadd.f32 %v2657_v61, %v2656_v59 }
 0xb3f   : > { %v2659_v2 = vpop.f32.mrf.mxu1 }
 0xb40   : > { %2111 = vst [vmem:[#allocation2] sm:$0xff] %v2108_v62  ;;  %v2102_v6 = vadd.f32 %v2658_v1, %v2564_v51  ;;  %2116 = sbr.rel (%p2581_p12) target bundleno = 3120 (0xc30), region = 104 }
 0xb41   : > { %v2660_v8 = vpop.f32.mrf.mxu1 }
 0xb42   : > { %v2109_v9 = vadd.f32 %v2102_v6, %v3696_v16 }
 0xb44   : > { %2112 = vst [vmem:[#allocation2 + $0x8] sm:$0x1f] %v2109_v9 }
 0xb45   : > { %v2990_v11 = vld [vmem:[%s3927_s18 + $0x38] sm:$0xff]   ;;  %v2117_v12 = vpack.c.bf16 %v2108_v62, %v2107_v57  ;;  %v2991_v15 = vld [vmem:[%s3927_s18 + $0x30] sm:$0xff]   ;;  %v2992_v16 = vld [vmem:[%s3927_s18 + $0x28] sm:$0xff]   ;;  %v2118_v4 = vpack.c.bf16 %v2109_v9, %v2109_v9 }
 0xb46   : > { %2748 = vmatprep.subr.bf16.mxu0 %v2990_v11  ;;  %v2993_v14 = vld [vmem:[%s3927_s18 + $0x20] sm:$0xff]   ;;  %v2994_v3 = vld [vmem:[%s3927_s18 + $0x18] sm:$0xff]   ;;  %v2995_v17 = vld [vmem:[%s3927_s18 + $0x10] sm:$0xff]  }
 0xb47   : > { %2764 = vmatprep.mubr.bf16.mxu0 %v2117_v12  ;;  %2749 = vmatpush3.bf16.msra.mxu0 %v2990_v11  ;;  %v2996_v18 = vld [vmem:[%s3927_s18 + $0x8] sm:$0xff]   ;;  %v2997_v19 = vld [vmem:[%s3927_s18] sm:$0xff]  }
 0xb48   : > { %2750 = vmatprep.subr.bf16.mxu0 %v2991_v15  ;;  %v2582_v5 = vld [vmem:[%s3928_s23] ss:$0 sm:$0xff] }
 0xb4b   : > { %2751 = vmatpush3.bf16.msra.mxu0 %v2991_v15 }
 0xb4c   : > { %2752 = vmatprep.subr.bf16.mxu0 %v2992_v16 }
 0xb4f   : > { %2753 = vmatpush3.bf16.msra.mxu0 %v2992_v16 }
 0xb50   : > { %2754 = vmatprep.subr.bf16.mxu0 %v2993_v14 }
 0xb53   : > { %2755 = vmatpush3.bf16.msra.mxu0 %v2993_v14 }
 0xb54   : > { %2756 = vmatprep.subr.bf16.mxu0 %v2994_v3 }
 0xb57   : > { %2757 = vmatpush3.bf16.msra.mxu0 %v2994_v3 }
 0xb58   : > { %2758 = vmatprep.subr.bf16.mxu0 %v2995_v17 }
 0xb5b   : > { %2759 = vmatpush3.bf16.msra.mxu0 %v2995_v17 }
 0xb5c   : > { %2760 = vmatprep.subr.bf16.mxu0 %v2996_v18 }
 0xb5f   : > { %2761 = vmatpush3.bf16.msra.mxu0 %v2996_v18 }
 0xb60   : > { %2762 = vmatprep.subr.bf16.mxu0 %v2997_v19 }
 0xb63   : > { %2763 = vmatpush3.bf16.msra.mxu0 %v2997_v19 }
 0xb66   : > { %2765 = vmatmul.mubr.bf16.vlgmr.msra.gmra.mxu0 %v2118_v4 }
 0xc26   : > { %v2766_v20 = vpop.f32.mrf.mxu0 }
 0xc27   : > { %v2233_v63 = vadd.f32 %v2766_v20, %v2582_v5 }
 0xc28   : > { %v2224_v21 = vpop.f32.mrf.mxu0 }
 0xc29   : > { %2240 = vst [vmem:[%s3511_s27 + $0x10] sm:$0x1f] %v2233_v63  ;;  %v2225_v0 = vadd.f32 %v2582_v5, %v2224_v21 }
 0xc2a   : > { %v2767_v22 = vpop.f32.mrf.mxu0 }
 0xc2b   : > { %2238 = vst [vmem:[%s3511_s27] sm:$0xff] %v2225_v0 }
 0xc2c   : > { %v2227_v24 = vpop.f32.mrf.mxu0 }
 0xc2d   : > { %v2228_v26 = vadd.f32 %v2582_v5, %v2227_v24 }
 0xc2f   : > { %2239 = vst [vmem:[%s3511_s27 + $0x8] sm:$0xff] %v2228_v26 }
 0xc30 PF: > { %s3929_s21 = sld [smem:[#allocation20_spill]] }
 0xc31   : > { %s3930_s26 = sld [smem:[#allocation16_spill]] }
 0xc32   : > { %s3931_s27 = sld [smem:[#allocation17_spill]] }
 0xc33   : > { %s3932_s28 = sld [smem:[#allocation23_spill]] }
 0xc34   : > { %s3933_s29 = sld [smem:[#allocation18_spill]] }
 0xc35   : > { %s3934_s30 = sld [smem:[#allocation19_spill]] }
 0xc36   : > { %s41_s17 = sadd.s32 1, %s3929_s21   ;;  %s3935_s9 = sld [smem:[#allocation21_spill]] }
 0xc37   : > { %p38_p4 = scmp.ge.s32.totalorder %s41_s17, 6   ;;  %s3936_s0 = sld [smem:[#allocation22_spill]] }
 0xc39   :  { %40 = sbr.rel (!%p38_p4) target bundleno = 45 (0x2d), region = 192 }
 0xc3e   :  { %2262 = vsyncpa [#allocation6], 1 }
 0xc3f   :  { %2264 = vsyncpa [#allocation6 + $0x1], 1 }
 0xc40   :  { %2265 = vsyncpa [#allocation8], 1 }
 0xc41   :  { %2267 = vsyncpa [#allocation8 + $0x1], 1 }
 0xc42   :  { %2268 = vsyncpa [#allocation11], 1 }
 0xc43   :  { %2270 = vsyncpa [#allocation11 + $0x1], 1 }

</bundles_post_ra>
